<compile_context>
chip_gen: v7x
topology: tpu7x:2x2x1
jax: 0.10.0
libtpu: 0.0.40
codegen_flags: <defaults>
</compile_context>

<pallas_src>
import functools

import jax
import jax.numpy as jnp
from jax import lax
from jax.experimental import pallas as pl
from jax.experimental.pallas import tpu as pltpu

PAD_IDX = 0
LANE = 128      # f32 lanes per vreg (last dim)
SUBLANE = 8     # f32 sublanes per vreg (second-to-last dim)


def _round_up(x, m):
    return (x + m - 1) // m * m


def _pad_gate_cols(w, h, hp):
    """Pad gate-blocked columns (..., 4*h) -> (..., 4*hp), zero-padding each of the 4 gates."""
    lead = w.shape[:-1]
    w = w.reshape(lead + (4, h))
    w = jnp.pad(w, [(0, 0)] * len(lead) + [(0, 0), (0, hp - h)])
    return w.reshape(lead + (4 * hp,))


def _pad_whh(w_hh, h, hp):
    """Pad recurrent weights (h, 4*h) -> (hp, 4*hp)."""
    w = _pad_gate_cols(w_hh, h, hp)
    return jnp.pad(w, ((0, hp - h), (0, 0)))


def _bilstm_kernel(gx_ref, whh_ref, len_ref, out_ref, hfin_ref, h_scr, c_scr, *,
                   time_block, hidden):
    """Fused bidirectional LSTM recurrence.

    Grid = (ndirections, n_time_blocks): direction axis "parallel", time axis sequential.
    gx_ref:   (TB, Bp, 4*Hp) f32  pre-projected input gates for this time block
    whh_ref:  (Hp, 4*Hp)     bf16 recurrent weights (resident across the time axis)
    len_ref:  (Bp, 1)        int32 sequence lengths (resident)
    out_ref:  (TB, Bp, Hp)   f32  per-step hidden outputs
    hfin_ref: (Bp, Hp)       f32  final hidden state (resident; written on last block only)
    """
    d = pl.program_id(0)          # 0 = forward, 1 = backward
    tg = pl.program_id(1)         # time-block counter (sequential)
    n_tb = pl.num_programs(1)
    TB, H = time_block, hidden

    @pl.when(tg == 0)
    def _():
        h_scr[...] = jnp.zeros_like(h_scr)
        c_scr[...] = jnp.zeros_like(c_scr)

    lengths = len_ref[...]        # (Bp, 1) int32
    whh = whh_ref[...]            # hoisted: one VMEM load per grid step, reused for all TB steps

    # First timestep covered by this block (the index_map already reversed block order for d=1).
    blk = tg + d * (n_tb - 1 - 2 * tg)
    base_t = blk * TB

    def step(s, carry):
        # Forward walks the block 0..TB-1; backward walks it TB-1..0 (scalar-unit arithmetic).
        i = s + d * (TB - 1 - 2 * s)
        t_actual = base_t + i

        h_prev = h_scr[...]
        c_prev = c_scr[...]

        # Only the recurrent projection runs in the sequential loop (bf16 MXU, f32 accumulate).
        gates = gx_ref[i] + jnp.dot(h_prev.astype(whh.dtype), whh,
                                    preferred_element_type=jnp.float32)
        i_g = jax.nn.sigmoid(gates[:, 0 * H:1 * H])    # lane-aligned slices (H % 128 == 0)
        f_g = jax.nn.sigmoid(gates[:, 1 * H:2 * H])
        g_g = jnp.tanh(gates[:, 2 * H:3 * H])
        o_g = jax.nn.sigmoid(gates[:, 3 * H:4 * H])

        c_new = f_g * c_prev + i_g * g_g
        h_new = o_g * jnp.tanh(c_new)

        # Packed-sequence masking: only valid timesteps update state / emit output.
        mask = t_actual < lengths                      # (Bp, 1) bool, broadcasts over lanes
        h_scr[...] = jnp.where(mask, h_new, h_prev)
        c_scr[...] = jnp.where(mask, c_new, c_prev)
        out_ref[i] = jnp.where(mask, h_new, 0.0)       # padded positions emit zeros
        return carry

    lax.fori_loop(0, TB, step, 0, unroll=True)

    @pl.when(tg == n_tb - 1)
    def _():
        hfin_ref[...] = h_scr[...]                     # final hidden, written once per direction


def bilstm_layer(gates_x, w_hh, lengths, *, time_block):
    """Run all directions of one LSTM layer with a single fused Pallas kernel.

    gates_x: (ndir, Tp, Bp, 4*Hp) f32  hoisted input projection (time-major)
    w_hh:    (ndir, Hp, 4*Hp)     bf16 recurrent weights
    lengths: (Bp, 1)              int32
    Returns (out (ndir, Tp, Bp, Hp) f32, h_final (ndir, Bp, Hp) f32).
    """
    ndir, Tp, Bp, H4 = gates_x.shape
    Hp = H4 // 4
    n_tb = Tp // time_block

    # Block index along time: forward visits blocks 0..n_tb-1, backward visits n_tb-1..0.
    tmap = lambda d, t: (d, t + d * (n_tb - 1 - 2 * t), 0, 0)

    kern = functools.partial(_bilstm_kernel, time_block=time_block, hidden=Hp)
    out, h_fin = pl.pallas_call(
        kern,
        out_shape=(jax.ShapeDtypeStruct((ndir, Tp, Bp, Hp), jnp.float32),
                   jax.ShapeDtypeStruct((ndir, Bp, Hp), jnp.float32)),
        grid_spec=pltpu.PrefetchScalarGridSpec(
            num_scalar_prefetch=0,
            grid=(ndir, n_tb),
            in_specs=[
                pl.BlockSpec((None, time_block, Bp, H4), tmap),           # gates_x time block
                pl.BlockSpec((None, Hp, H4), lambda d, t: (d, 0, 0)),     # W_hh (resident per dir)
                pl.BlockSpec((Bp, 1), lambda d, t: (0, 0)),               # lengths (resident)
            ],
            out_specs=(
                pl.BlockSpec((None, time_block, Bp, Hp), tmap),           # per-step hidden output
                pl.BlockSpec((None, Bp, Hp), lambda d, t: (d, 0, 0)),     # final hidden (resident)
            ),
            scratch_shapes=[pltpu.VMEM((Bp, Hp), jnp.float32),            # h state
                            pltpu.VMEM((Bp, Hp), jnp.float32)],           # c state
        ),
        compiler_params=pltpu.CompilerParams(
            dimension_semantics=("parallel", "arbitrary")),  # dirs parallel; recurrence sequential
    )(gates_x, w_hh, lengths)
    return out, h_fin


def init_params(key, vocab_size, d_model, h_dim, nlayers, ndirections):
    """Deterministic synthetic parameters mirroring nn.Embedding + nn.LSTM shapes."""
    params = {}
    k_emb, key = jax.random.split(key)
    emb = jax.random.normal(k_emb, (vocab_size, d_model), jnp.float32)
    emb = emb.at[PAD_IDX].set(0.0)   # padding_idx=0
    params['embedding'] = emb

    bound = 1.0 / (h_dim ** 0.5)
    layers = []
    for l in range(nlayers):
        in_dim = d_model if l == 0 else h_dim * ndirections
        dirs = []
        for _ in range(ndirections):
            key, k1, k2, k3, k4 = jax.random.split(key, 5)
            w_ih = jax.random.uniform(k1, (in_dim, 4 * h_dim), jnp.float32, -bound, bound)
            w_hh = jax.random.uniform(k2, (h_dim, 4 * h_dim), jnp.float32, -bound, bound)
            b_ih = jax.random.uniform(k3, (4 * h_dim,), jnp.float32, -bound, bound)
            b_hh = jax.random.uniform(k4, (4 * h_dim,), jnp.float32, -bound, bound)
            dirs.append((w_ih, w_hh, b_ih + b_hh))
        layers.append(dirs)
    params['layers'] = layers
    return params


def lstm_encoder_forward(enc_in, params, *, time_block=8):
    B, T = enc_in.shape
    nopad_mask = enc_in != PAD_IDX
    lengths = nopad_mask.sum(axis=-1).astype(jnp.int32)          # (B,)

    h_dim = params['layers'][0][0][1].shape[0]                   # w_hh is (H, 4H); static shape
    Hp = _round_up(h_dim, LANE)       # lane-dense hidden
    Bp = _round_up(B, SUBLANE)        # sublane-dense batch
    Tp = _round_up(T, time_block)     # whole number of time blocks

    # Padded batch rows get length 0 -> fully masked inside the kernel.
    len_pad = jnp.zeros((Bp, 1), jnp.int32).at[:B, 0].set(lengths)

    # Embedding lookup (glue; gather in plain JAX, padding row is zero).
    emb = params['embedding'][enc_in]                            # (B, T, D)
    x = jnp.transpose(emb, (1, 0, 2)).astype(jnp.float32)        # (T, B, D) time-major

    h_finals = None
    for layer in params['layers']:
        ndir = len(layer)
        d_in = x.shape[-1]
        x_pad = jnp.zeros((Tp, Bp, d_in), jnp.float32).at[:T, :B, :].set(x)

        # Hoisted, time-parallel input projection for ALL directions at once: a single large
        # MXU einsum (bf16 inputs, f32 accumulation) instead of tiny per-step matmuls.
        w_ih_p = jnp.stack([_pad_gate_cols(w_ih, h_dim, Hp) for (w_ih, _, _) in layer])
        b_p = jnp.stack([_pad_gate_cols(b[None, :], h_dim, Hp)[0] for (_, _, b) in layer])
        gx = jnp.einsum('tbd,ndg->ntbg',
                        x_pad.astype(jnp.bfloat16),
                        w_ih_p.astype(jnp.bfloat16),
                        preferred_element_type=jnp.float32) + b_p[:, None, None, :]
        whh = jnp.stack([_pad_whh(w_hh, h_dim, Hp) for (_, w_hh, _) in layer]
                        ).astype(jnp.bfloat16)                   # (ndir, Hp, 4*Hp)

        out, h_fin = bilstm_layer(gx, whh, len_pad, time_block=time_block)

        x = jnp.concatenate([out[d, :T, :B, :h_dim] for d in range(ndir)], axis=-1)
        h_finals = [h_fin[d, :B, :h_dim] for d in range(ndir)]

    sequence = jnp.transpose(x, (1, 0, 2))                       # (B, T, H*ndir), batch_first
    final = jnp.concatenate(h_finals, axis=-1)                   # (B, H*ndir)  [fwd | bwd]
    # TODO(synk): pad_packed_sequence also truncates T to max(lengths) (data-dependent shape);
    # not replicated here — padded timesteps are emitted as zeros instead.
    return {'sequence': sequence, 'nopad_mask': nopad_mask, 'final_state': final}


if __name__ == "__main__":
    VOCAB, D_MODEL, H_DIM, NLAYERS, NDIR = 32, 16, 32, 1, 2
    B, T = 2, 8

    key = jax.random.PRNGKey(0)
    key_tok, key_p = jax.random.split(key)

    tokens = jax.random.randint(key_tok, (B, T), 1, VOCAB, dtype=jnp.int32)
    tokens = tokens.at[1, 5:].set(PAD_IDX)   # seq 0 full length (T_out == T), seq 1 has length 5

    params = init_params(key_p, VOCAB, D_MODEL, H_DIM, NLAYERS, NDIR)

    fwd = jax.jit(functools.partial(lstm_encoder_forward, time_block=8))
    out = fwd(tokens, params)
    jax.block_until_ready(out)

    assert out['sequence'].shape == (B, T, H_DIM * NDIR)
    assert out['nopad_mask'].shape == (B, T)
    assert out['final_state'].shape == (B, H_DIM * NDIR)
    print("KERNEL_OK")
</pallas_src>

<mosaic_0001>
module attributes {stable_mosaic.version = 11 : i64} {
  func.func @_bilstm_kernel(%arg0: i32, %arg1: i32, %arg2: memref<1x8x8x512xf32, #tpu.memory_space<vmem>>, %arg3: memref<1x128x512xbf16, #tpu.memory_space<vmem>>, %arg4: memref<8x1xi32, #tpu.memory_space<vmem>>, %arg5: memref<1x8x8x128xf32, #tpu.memory_space<vmem>>, %arg6: memref<1x8x128xf32, #tpu.memory_space<vmem>>, %arg7: memref<8x128xf32, #tpu.memory_space<vmem>>, %arg8: memref<8x128xf32, #tpu.memory_space<vmem>>) attributes {dimension_semantics = [#tpu.dimension_semantics<parallel>, #tpu.dimension_semantics<arbitrary>], iteration_bounds = array<i64: 2, 1>, scalar_prefetch = 0 : i64, scratch_operands = 2 : i64, tpu.core_type = #tpu.core_type<tc>, window_params = [{transform_indices = @transform_0, window_bounds = array<i64: 1, 8, 8, 512>}, {transform_indices = @transform_1, window_bounds = array<i64: 1, 128, 512>}, {pipeline_mode = #tpu.pipeline_mode<synchronous>, transform_indices = @transform_2, window_bounds = array<i64: 8, 1>}, {transform_indices = @transform_3, window_bounds = array<i64: 1, 8, 8, 128>}, {transform_indices = @transform_4, window_bounds = array<i64: 1, 8, 128>}]} {
    %c0_i32 = arith.constant 0 : i32
    %0 = arith.cmpi eq, %arg1, %c0_i32 : i32
    %1 = arith.extui %0 : i1 to i32
    %c0_i32_0 = arith.constant 0 : i32
    %2 = arith.cmpi ne, %1, %c0_i32_0 : i32
    scf.if %2 {
      %cst_178 = arith.constant 0.000000e+00 : f32
      %462 = vector.broadcast %cst_178 : f32 to vector<8x128xf32>
      %c0_179 = arith.constant 0 : index
      %c0_180 = arith.constant 0 : index
      %463 = vector.load %arg7[%c0_179, %c0_180] : memref<8x128xf32, #tpu.memory_space<vmem>>, vector<8x128xf32>
      tpu.vector_store %arg7[%c0_179, %c0_180], %462 {strides = array<i32>} : memref<8x128xf32, #tpu.memory_space<vmem>>, vector<8x128xf32>,
      %cst_181 = arith.constant 0.000000e+00 : f32
      %464 = vector.broadcast %cst_181 : f32 to vector<8x128xf32>
      %c0_182 = arith.constant 0 : index
      %c0_183 = arith.constant 0 : index
      %465 = vector.load %arg8[%c0_182, %c0_183] : memref<8x128xf32, #tpu.memory_space<vmem>>, vector<8x128xf32>
      tpu.vector_store %arg8[%c0_182, %c0_183], %464 {strides = array<i32>} : memref<8x128xf32, #tpu.memory_space<vmem>>, vector<8x128xf32>,
    } else {
    }
    %c0 = arith.constant 0 : index
    %c0_1 = arith.constant 0 : index
    %3 = vector.load %arg4[%c0, %c0_1] : memref<8x1xi32, #tpu.memory_space<vmem>>, vector<8x1xi32>
    %c0_2 = arith.constant 0 : index
    %c0_3 = arith.constant 0 : index
    %c0_4 = arith.constant 0 : index
    %4 = vector.load %arg3[%c0_2, %c0_3, %c0_4] : memref<1x128x512xbf16, #tpu.memory_space<vmem>>, vector<1x128x512xbf16>
    %5 = vector.shape_cast %4 : vector<1x128x512xbf16> to vector<128x512xbf16>
    %c2_i32 = arith.constant 2 : i32
    %6 = arith.muli %c2_i32, %arg1 : i32
    %c0_i32_5 = arith.constant 0 : i32
    %7 = arith.subi %c0_i32_5, %6 : i32
    %8 = arith.muli %arg0, %7 : i32
    %9 = arith.addi %arg1, %8 : i32
    %c8_i32 = arith.constant 8 : i32
    %10 = arith.muli %9, %c8_i32 : i32
    %c0_i32_6 = arith.constant 0 : i32
    %c2_i32_7 = arith.constant 2 : i32
    %11 = arith.muli %c2_i32_7, %c0_i32_6 : i32
    %c7_i32 = arith.constant 7 : i32
    %12 = arith.subi %c7_i32, %11 : i32
    %13 = arith.muli %arg0, %12 : i32
    %14 = arith.addi %c0_i32_6, %13 : i32
    %15 = arith.addi %10, %14 : i32
    %c0_8 = arith.constant 0 : index
    %c0_9 = arith.constant 0 : index
    %16 = vector.load %arg7[%c0_8, %c0_9] : memref<8x128xf32, #tpu.memory_space<vmem>>, vector<8x128xf32>
    %c0_10 = arith.constant 0 : index
    %c0_11 = arith.constant 0 : index
    %17 = vector.load %arg8[%c0_10, %c0_11] : memref<8x128xf32, #tpu.memory_space<vmem>>, vector<8x128xf32>
    %c0_12 = arith.constant 0 : index
    %18 = arith.index_cast %14 : i32 to index
    %c0_13 = arith.constant 0 : index
    %c0_14 = arith.constant 0 : index
    %19 = vector.load %arg2[%c0_12, %18, %c0_13, %c0_14] : memref<1x8x8x512xf32, #tpu.memory_space<vmem>>, vector<1x1x8x512xf32>
    %20 = vector.shape_cast %19 : vector<1x1x8x512xf32> to vector<8x512xf32>
    %21 = arith.truncf %16 : vector<8x128xf32> to vector<8x128xbf16>
    %cst = arith.constant dense<0.000000e+00> : vector<8x512xf32>
    %22 = tpu.matmul %21, %5, %cst {dimension_numbers = #tpu.dot_dimension_numbers<[1], [0], [0], [1], [0, 0, 1, 1], [], []>} : vector<8x128xbf16>, vector<128x512xbf16>, vector<8x512xf32> -> vector<8x512xf32>
    %23 = arith.addf %20, %22 : vector<8x512xf32>
    %24 = vector.extract_strided_slice %23 {offsets = [0, 0], sizes = [8, 128], strides = [1, 1]} : vector<8x512xf32> to vector<8x128xf32>
    %25 = arith.negf %24 : vector<8x128xf32>
    %26 = math.exp %25 : vector<8x128xf32>
    %cst_15 = arith.constant 1.000000e+00 : f32
    %27 = vector.broadcast %cst_15 : f32 to vector<8x128xf32>
    %28 = arith.addf %27, %26 : vector<8x128xf32>
    %29 = arith.divf %27, %28 : vector<8x128xf32>
    %30 = vector.extract_strided_slice %23 {offsets = [0, 128], sizes = [8, 128], strides = [1, 1]} : vector<8x512xf32> to vector<8x128xf32>
    %31 = arith.negf %30 : vector<8x128xf32>
    %32 = math.exp %31 : vector<8x128xf32>
    %cst_16 = arith.constant 1.000000e+00 : f32
    %33 = vector.broadcast %cst_16 : f32 to vector<8x128xf32>
    %34 = arith.addf %33, %32 : vector<8x128xf32>
    %35 = arith.divf %33, %34 : vector<8x128xf32>
    %36 = vector.extract_strided_slice %23 {offsets = [0, 256], sizes = [8, 128], strides = [1, 1]} : vector<8x512xf32> to vector<8x128xf32>
    %37 = math.tanh %36 : vector<8x128xf32>
    %38 = vector.extract_strided_slice %23 {offsets = [0, 384], sizes = [8, 128], strides = [1, 1]} : vector<8x512xf32> to vector<8x128xf32>
    %39 = arith.negf %38 : vector<8x128xf32>
    %40 = math.exp %39 : vector<8x128xf32>
    %cst_17 = arith.constant 1.000000e+00 : f32
    %41 = vector.broadcast %cst_17 : f32 to vector<8x128xf32>
    %42 = arith.addf %41, %40 : vector<8x128xf32>
    %43 = arith.divf %41, %42 : vector<8x128xf32>
    %44 = arith.mulf %35, %17 : vector<8x128xf32>
    %45 = arith.mulf %29, %37 : vector<8x128xf32>
    %46 = arith.addf %44, %45 : vector<8x128xf32>
    %47 = math.tanh %46 : vector<8x128xf32>
    %48 = arith.mulf %43, %47 : vector<8x128xf32>
    %49 = vector.broadcast %15 : i32 to vector<8x1xi32>
    %50 = arith.cmpi slt, %49, %3 : vector<8x1xi32>
    %51 = vector.shape_cast %50 : vector<8x1xi1> to vector<8x1xi1>
    %52 = vector.broadcast %51 : vector<8x1xi1> to vector<8x128xi1>
    %53 = arith.select %52, %48, %16 : vector<8x128xi1>, vector<8x128xf32>
    %c0_18 = arith.constant 0 : index
    %c0_19 = arith.constant 0 : index
    %54 = vector.load %arg7[%c0_18, %c0_19] : memref<8x128xf32, #tpu.memory_space<vmem>>, vector<8x128xf32>
    tpu.vector_store %arg7[%c0_18, %c0_19], %53 {strides = array<i32>} : memref<8x128xf32, #tpu.memory_space<vmem>>, vector<8x128xf32>,
    %55 = vector.shape_cast %50 : vector<8x1xi1> to vector<8x1xi1>
    %56 = vector.broadcast %55 : vector<8x1xi1> to vector<8x128xi1>
    %57 = arith.select %56, %46, %17 : vector<8x128xi1>, vector<8x128xf32>
    %c0_20 = arith.constant 0 : index
    %c0_21 = arith.constant 0 : index
    %58 = vector.load %arg8[%c0_20, %c0_21] : memref<8x128xf32, #tpu.memory_space<vmem>>, vector<8x128xf32>
    tpu.vector_store %arg8[%c0_20, %c0_21], %57 {strides = array<i32>} : memref<8x128xf32, #tpu.memory_space<vmem>>, vector<8x128xf32>,
    %cst_22 = arith.constant 0.000000e+00 : f32
    %59 = vector.shape_cast %50 : vector<8x1xi1> to vector<8x1xi1>
    %60 = vector.broadcast %59 : vector<8x1xi1> to vector<8x128xi1>
    %61 = vector.broadcast %cst_22 : f32 to vector<8x128xf32>
    %62 = arith.select %60, %48, %61 : vector<8x128xi1>, vector<8x128xf32>
    %c0_23 = arith.constant 0 : index
    %63 = arith.index_cast %14 : i32 to index
    %c0_24 = arith.constant 0 : index
    %c0_25 = arith.constant 0 : index
    %64 = vector.load %arg5[%c0_23, %63, %c0_24, %c0_25] : memref<1x8x8x128xf32, #tpu.memory_space<vmem>>, vector<1x1x8x128xf32>
    %65 = vector.shape_cast %64 : vector<1x1x8x128xf32> to vector<8x128xf32>
    %66 = vector.shape_cast %62 : vector<8x128xf32> to vector<1x1x8x128xf32>
    tpu.vector_store %arg5[%c0_23, %63, %c0_24, %c0_25], %66 {strides = array<i32>} : memref<1x8x8x128xf32, #tpu.memory_space<vmem>>, vector<1x1x8x128xf32>,
    %c1_i32 = arith.constant 1 : i32
    %c2_i32_26 = arith.constant 2 : i32
    %67 = arith.muli %c2_i32_26, %c1_i32 : i32
    %c7_i32_27 = arith.constant 7 : i32
    %68 = arith.subi %c7_i32_27, %67 : i32
    %69 = arith.muli %arg0, %68 : i32
    %70 = arith.addi %c1_i32, %69 : i32
    %71 = arith.addi %10, %70 : i32
    %c0_28 = arith.constant 0 : index
    %c0_29 = arith.constant 0 : index
    %72 = vector.load %arg7[%c0_28, %c0_29] : memref<8x128xf32, #tpu.memory_space<vmem>>, vector<8x128xf32>
    %c0_30 = arith.constant 0 : index
    %c0_31 = arith.constant 0 : index
    %73 = vector.load %arg8[%c0_30, %c0_31] : memref<8x128xf32, #tpu.memory_space<vmem>>, vector<8x128xf32>
    %c0_32 = arith.constant 0 : index
    %74 = arith.index_cast %70 : i32 to index
    %c0_33 = arith.constant 0 : index
    %c0_34 = arith.constant 0 : index
    %75 = vector.load %arg2[%c0_32, %74, %c0_33, %c0_34] : memref<1x8x8x512xf32, #tpu.memory_space<vmem>>, vector<1x1x8x512xf32>
    %76 = vector.shape_cast %75 : vector<1x1x8x512xf32> to vector<8x512xf32>
    %77 = arith.truncf %72 : vector<8x128xf32> to vector<8x128xbf16>
    %cst_35 = arith.constant dense<0.000000e+00> : vector<8x512xf32>
    %78 = tpu.matmul %77, %5, %cst_35 {dimension_numbers = #tpu.dot_dimension_numbers<[1], [0], [0], [1], [0, 0, 1, 1], [], []>} : vector<8x128xbf16>, vector<128x512xbf16>, vector<8x512xf32> -> vector<8x512xf32>
    %79 = arith.addf %76, %78 : vector<8x512xf32>
    %80 = vector.extract_strided_slice %79 {offsets = [0, 0], sizes = [8, 128], strides = [1, 1]} : vector<8x512xf32> to vector<8x128xf32>
    %81 = arith.negf %80 : vector<8x128xf32>
    %82 = math.exp %81 : vector<8x128xf32>
    %cst_36 = arith.constant 1.000000e+00 : f32
    %83 = vector.broadcast %cst_36 : f32 to vector<8x128xf32>
    %84 = arith.addf %83, %82 : vector<8x128xf32>
    %85 = arith.divf %83, %84 : vector<8x128xf32>
    %86 = vector.extract_strided_slice %79 {offsets = [0, 128], sizes = [8, 128], strides = [1, 1]} : vector<8x512xf32> to vector<8x128xf32>
    %87 = arith.negf %86 : vector<8x128xf32>
    %88 = math.exp %87 : vector<8x128xf32>
    %cst_37 = arith.constant 1.000000e+00 : f32
    %89 = vector.broadcast %cst_37 : f32 to vector<8x128xf32>
    %90 = arith.addf %89, %88 : vector<8x128xf32>
    %91 = arith.divf %89, %90 : vector<8x128xf32>
    %92 = vector.extract_strided_slice %79 {offsets = [0, 256], sizes = [8, 128], strides = [1, 1]} : vector<8x512xf32> to vector<8x128xf32>
    %93 = math.tanh %92 : vector<8x128xf32>
    %94 = vector.extract_strided_slice %79 {offsets = [0, 384], sizes = [8, 128], strides = [1, 1]} : vector<8x512xf32> to vector<8x128xf32>
    %95 = arith.negf %94 : vector<8x128xf32>
    %96 = math.exp %95 : vector<8x128xf32>
    %cst_38 = arith.constant 1.000000e+00 : f32
    %97 = vector.broadcast %cst_38 : f32 to vector<8x128xf32>
    %98 = arith.addf %97, %96 : vector<8x128xf32>
    %99 = arith.divf %97, %98 : vector<8x128xf32>
    %100 = arith.mulf %91, %73 : vector<8x128xf32>
    %101 = arith.mulf %85, %93 : vector<8x128xf32>
    %102 = arith.addf %100, %101 : vector<8x128xf32>
    %103 = math.tanh %102 : vector<8x128xf32>
    %104 = arith.mulf %99, %103 : vector<8x128xf32>
    %105 = vector.broadcast %71 : i32 to vector<8x1xi32>
    %106 = arith.cmpi slt, %105, %3 : vector<8x1xi32>
    %107 = vector.shape_cast %106 : vector<8x1xi1> to vector<8x1xi1>
    %108 = vector.broadcast %107 : vector<8x1xi1> to vector<8x128xi1>
    %109 = arith.select %108, %104, %72 : vector<8x128xi1>, vector<8x128xf32>
    %c0_39 = arith.constant 0 : index
    %c0_40 = arith.constant 0 : index
    %110 = vector.load %arg7[%c0_39, %c0_40] : memref<8x128xf32, #tpu.memory_space<vmem>>, vector<8x128xf32>
    tpu.vector_store %arg7[%c0_39, %c0_40], %109 {strides = array<i32>} : memref<8x128xf32, #tpu.memory_space<vmem>>, vector<8x128xf32>,
    %111 = vector.shape_cast %106 : vector<8x1xi1> to vector<8x1xi1>
    %112 = vector.broadcast %111 : vector<8x1xi1> to vector<8x128xi1>
    %113 = arith.select %112, %102, %73 : vector<8x128xi1>, vector<8x128xf32>
    %c0_41 = arith.constant 0 : index
    %c0_42 = arith.constant 0 : index
    %114 = vector.load %arg8[%c0_41, %c0_42] : memref<8x128xf32, #tpu.memory_space<vmem>>, vector<8x128xf32>
    tpu.vector_store %arg8[%c0_41, %c0_42], %113 {strides = array<i32>} : memref<8x128xf32, #tpu.memory_space<vmem>>, vector<8x128xf32>,
    %cst_43 = arith.constant 0.000000e+00 : f32
    %115 = vector.shape_cast %106 : vector<8x1xi1> to vector<8x1xi1>
    %116 = vector.broadcast %115 : vector<8x1xi1> to vector<8x128xi1>
    %117 = vector.broadcast %cst_43 : f32 to vector<8x128xf32>
    %118 = arith.select %116, %104, %117 : vector<8x128xi1>, vector<8x128xf32>
    %c0_44 = arith.constant 0 : index
    %119 = arith.index_cast %70 : i32 to index
    %c0_45 = arith.constant 0 : index
    %c0_46 = arith.constant 0 : index
    %120 = vector.load %arg5[%c0_44, %119, %c0_45, %c0_46] : memref<1x8x8x128xf32, #tpu.memory_space<vmem>>, vector<1x1x8x128xf32>
    %121 = vector.shape_cast %120 : vector<1x1x8x128xf32> to vector<8x128xf32>
    %122 = vector.shape_cast %118 : vector<8x128xf32> to vector<1x1x8x128xf32>
    tpu.vector_store %arg5[%c0_44, %119, %c0_45, %c0_46], %122 {strides = array<i32>} : memref<1x8x8x128xf32, #tpu.memory_space<vmem>>, vector<1x1x8x128xf32>,
    %c2_i32_47 = arith.constant 2 : i32
    %c2_i32_48 = arith.constant 2 : i32
    %123 = arith.muli %c2_i32_48, %c2_i32_47 : i32
    %c7_i32_49 = arith.constant 7 : i32
    %124 = arith.subi %c7_i32_49, %123 : i32
    %125 = arith.muli %arg0, %124 : i32
    %126 = arith.addi %c2_i32_47, %125 : i32
    %127 = arith.addi %10, %126 : i32
    %c0_50 = arith.constant 0 : index
    %c0_51 = arith.constant 0 : index
    %128 = vector.load %arg7[%c0_50, %c0_51] : memref<8x128xf32, #tpu.memory_space<vmem>>, vector<8x128xf32>
    %c0_52 = arith.constant 0 : index
    %c0_53 = arith.constant 0 : index
    %129 = vector.load %arg8[%c0_52, %c0_53] : memref<8x128xf32, #tpu.memory_space<vmem>>, vector<8x128xf32>
    %c0_54 = arith.constant 0 : index
    %130 = arith.index_cast %126 : i32 to index
    %c0_55 = arith.constant 0 : index
    %c0_56 = arith.constant 0 : index
    %131 = vector.load %arg2[%c0_54, %130, %c0_55, %c0_56] : memref<1x8x8x512xf32, #tpu.memory_space<vmem>>, vector<1x1x8x512xf32>
    %132 = vector.shape_cast %131 : vector<1x1x8x512xf32> to vector<8x512xf32>
    %133 = arith.truncf %128 : vector<8x128xf32> to vector<8x128xbf16>
    %cst_57 = arith.constant dense<0.000000e+00> : vector<8x512xf32>
    %134 = tpu.matmul %133, %5, %cst_57 {dimension_numbers = #tpu.dot_dimension_numbers<[1], [0], [0], [1], [0, 0, 1, 1], [], []>} : vector<8x128xbf16>, vector<128x512xbf16>, vector<8x512xf32> -> vector<8x512xf32>
    %135 = arith.addf %132, %134 : vector<8x512xf32>
    %136 = vector.extract_strided_slice %135 {offsets = [0, 0], sizes = [8, 128], strides = [1, 1]} : vector<8x512xf32> to vector<8x128xf32>
    %137 = arith.negf %136 : vector<8x128xf32>
    %138 = math.exp %137 : vector<8x128xf32>
    %cst_58 = arith.constant 1.000000e+00 : f32
    %139 = vector.broadcast %cst_58 : f32 to vector<8x128xf32>
    %140 = arith.addf %139, %138 : vector<8x128xf32>
    %141 = arith.divf %139, %140 : vector<8x128xf32>
    %142 = vector.extract_strided_slice %135 {offsets = [0, 128], sizes = [8, 128], strides = [1, 1]} : vector<8x512xf32> to vector<8x128xf32>
    %143 = arith.negf %142 : vector<8x128xf32>
    %144 = math.exp %143 : vector<8x128xf32>
    %cst_59 = arith.constant 1.000000e+00 : f32
    %145 = vector.broadcast %cst_59 : f32 to vector<8x128xf32>
    %146 = arith.addf %145, %144 : vector<8x128xf32>
    %147 = arith.divf %145, %146 : vector<8x128xf32>
    %148 = vector.extract_strided_slice %135 {offsets = [0, 256], sizes = [8, 128], strides = [1, 1]} : vector<8x512xf32> to vector<8x128xf32>
    %149 = math.tanh %148 : vector<8x128xf32>
    %150 = vector.extract_strided_slice %135 {offsets = [0, 384], sizes = [8, 128], strides = [1, 1]} : vector<8x512xf32> to vector<8x128xf32>
    %151 = arith.negf %150 : vector<8x128xf32>
    %152 = math.exp %151 : vector<8x128xf32>
    %cst_60 = arith.constant 1.000000e+00 : f32
    %153 = vector.broadcast %cst_60 : f32 to vector<8x128xf32>
    %154 = arith.addf %153, %152 : vector<8x128xf32>
    %155 = arith.divf %153, %154 : vector<8x128xf32>
    %156 = arith.mulf %147, %129 : vector<8x128xf32>
    %157 = arith.mulf %141, %149 : vector<8x128xf32>
    %158 = arith.addf %156, %157 : vector<8x128xf32>
    %159 = math.tanh %158 : vector<8x128xf32>
    %160 = arith.mulf %155, %159 : vector<8x128xf32>
    %161 = vector.broadcast %127 : i32 to vector<8x1xi32>
    %162 = arith.cmpi slt, %161, %3 : vector<8x1xi32>
    %163 = vector.shape_cast %162 : vector<8x1xi1> to vector<8x1xi1>
    %164 = vector.broadcast %163 : vector<8x1xi1> to vector<8x128xi1>
    %165 = arith.select %164, %160, %128 : vector<8x128xi1>, vector<8x128xf32>
    %c0_61 = arith.constant 0 : index
    %c0_62 = arith.constant 0 : index
    %166 = vector.load %arg7[%c0_61, %c0_62] : memref<8x128xf32, #tpu.memory_space<vmem>>, vector<8x128xf32>
    tpu.vector_store %arg7[%c0_61, %c0_62], %165 {strides = array<i32>} : memref<8x128xf32, #tpu.memory_space<vmem>>, vector<8x128xf32>,
    %167 = vector.shape_cast %162 : vector<8x1xi1> to vector<8x1xi1>
    %168 = vector.broadcast %167 : vector<8x1xi1> to vector<8x128xi1>
    %169 = arith.select %168, %158, %129 : vector<8x128xi1>, vector<8x128xf32>
    %c0_63 = arith.constant 0 : index
    %c0_64 = arith.constant 0 : index
    %170 = vector.load %arg8[%c0_63, %c0_64] : memref<8x128xf32, #tpu.memory_space<vmem>>, vector<8x128xf32>
    tpu.vector_store %arg8[%c0_63, %c0_64], %169 {strides = array<i32>} : memref<8x128xf32, #tpu.memory_space<vmem>>, vector<8x128xf32>,
    %cst_65 = arith.constant 0.000000e+00 : f32
    %171 = vector.shape_cast %162 : vector<8x1xi1> to vector<8x1xi1>
    %172 = vector.broadcast %171 : vector<8x1xi1> to vector<8x128xi1>
    %173 = vector.broadcast %cst_65 : f32 to vector<8x128xf32>
    %174 = arith.select %172, %160, %173 : vector<8x128xi1>, vector<8x128xf32>
    %c0_66 = arith.constant 0 : index
    %175 = arith.index_cast %126 : i32 to index
    %c0_67 = arith.constant 0 : index
    %c0_68 = arith.constant 0 : index
    %176 = vector.load %arg5[%c0_66, %175, %c0_67, %c0_68] : memref<1x8x8x128xf32, #tpu.memory_space<vmem>>, vector<1x1x8x128xf32>
    %177 = vector.shape_cast %176 : vector<1x1x8x128xf32> to vector<8x128xf32>
    %178 = vector.shape_cast %174 : vector<8x128xf32> to vector<1x1x8x128xf32>
    tpu.vector_store %arg5[%c0_66, %175, %c0_67, %c0_68], %178 {strides = array<i32>} : memref<1x8x8x128xf32, #tpu.memory_space<vmem>>, vector<1x1x8x128xf32>,
    %c3_i32 = arith.constant 3 : i32
    %c2_i32_69 = arith.constant 2 : i32
    %179 = arith.muli %c2_i32_69, %c3_i32 : i32
    %c7_i32_70 = arith.constant 7 : i32
    %180 = arith.subi %c7_i32_70, %179 : i32
    %181 = arith.muli %arg0, %180 : i32
    %182 = arith.addi %c3_i32, %181 : i32
    %183 = arith.addi %10, %182 : i32
    %c0_71 = arith.constant 0 : index
    %c0_72 = arith.constant 0 : index
    %184 = vector.load %arg7[%c0_71, %c0_72] : memref<8x128xf32, #tpu.memory_space<vmem>>, vector<8x128xf32>
    %c0_73 = arith.constant 0 : index
    %c0_74 = arith.constant 0 : index
    %185 = vector.load %arg8[%c0_73, %c0_74] : memref<8x128xf32, #tpu.memory_space<vmem>>, vector<8x128xf32>
    %c0_75 = arith.constant 0 : index
    %186 = arith.index_cast %182 : i32 to index
    %c0_76 = arith.constant 0 : index
    %c0_77 = arith.constant 0 : index
    %187 = vector.load %arg2[%c0_75, %186, %c0_76, %c0_77] : memref<1x8x8x512xf32, #tpu.memory_space<vmem>>, vector<1x1x8x512xf32>
    %188 = vector.shape_cast %187 : vector<1x1x8x512xf32> to vector<8x512xf32>
    %189 = arith.truncf %184 : vector<8x128xf32> to vector<8x128xbf16>
    %cst_78 = arith.constant dense<0.000000e+00> : vector<8x512xf32>
    %190 = tpu.matmul %189, %5, %cst_78 {dimension_numbers = #tpu.dot_dimension_numbers<[1], [0], [0], [1], [0, 0, 1, 1], [], []>} : vector<8x128xbf16>, vector<128x512xbf16>, vector<8x512xf32> -> vector<8x512xf32>
    %191 = arith.addf %188, %190 : vector<8x512xf32>
    %192 = vector.extract_strided_slice %191 {offsets = [0, 0], sizes = [8, 128], strides = [1, 1]} : vector<8x512xf32> to vector<8x128xf32>
    %193 = arith.negf %192 : vector<8x128xf32>
    %194 = math.exp %193 : vector<8x128xf32>
    %cst_79 = arith.constant 1.000000e+00 : f32
    %195 = vector.broadcast %cst_79 : f32 to vector<8x128xf32>
    %196 = arith.addf %195, %194 : vector<8x128xf32>
    %197 = arith.divf %195, %196 : vector<8x128xf32>
    %198 = vector.extract_strided_slice %191 {offsets = [0, 128], sizes = [8, 128], strides = [1, 1]} : vector<8x512xf32> to vector<8x128xf32>
    %199 = arith.negf %198 : vector<8x128xf32>
    %200 = math.exp %199 : vector<8x128xf32>
    %cst_80 = arith.constant 1.000000e+00 : f32
    %201 = vector.broadcast %cst_80 : f32 to vector<8x128xf32>
    %202 = arith.addf %201, %200 : vector<8x128xf32>
    %203 = arith.divf %201, %202 : vector<8x128xf32>
    %204 = vector.extract_strided_slice %191 {offsets = [0, 256], sizes = [8, 128], strides = [1, 1]} : vector<8x512xf32> to vector<8x128xf32>
    %205 = math.tanh %204 : vector<8x128xf32>
    %206 = vector.extract_strided_slice %191 {offsets = [0, 384], sizes = [8, 128], strides = [1, 1]} : vector<8x512xf32> to vector<8x128xf32>
    %207 = arith.negf %206 : vector<8x128xf32>
    %208 = math.exp %207 : vector<8x128xf32>
    %cst_81 = arith.constant 1.000000e+00 : f32
    %209 = vector.broadcast %cst_81 : f32 to vector<8x128xf32>
    %210 = arith.addf %209, %208 : vector<8x128xf32>
    %211 = arith.divf %209, %210 : vector<8x128xf32>
    %212 = arith.mulf %203, %185 : vector<8x128xf32>
    %213 = arith.mulf %197, %205 : vector<8x128xf32>
    %214 = arith.addf %212, %213 : vector<8x128xf32>
    %215 = math.tanh %214 : vector<8x128xf32>
    %216 = arith.mulf %211, %215 : vector<8x128xf32>
    %217 = vector.broadcast %183 : i32 to vector<8x1xi32>
    %218 = arith.cmpi slt, %217, %3 : vector<8x1xi32>
    %219 = vector.shape_cast %218 : vector<8x1xi1> to vector<8x1xi1>
    %220 = vector.broadcast %219 : vector<8x1xi1> to vector<8x128xi1>
    %221 = arith.select %220, %216, %184 : vector<8x128xi1>, vector<8x128xf32>
    %c0_82 = arith.constant 0 : index
    %c0_83 = arith.constant 0 : index
    %222 = vector.load %arg7[%c0_82, %c0_83] : memref<8x128xf32, #tpu.memory_space<vmem>>, vector<8x128xf32>
    tpu.vector_store %arg7[%c0_82, %c0_83], %221 {strides = array<i32>} : memref<8x128xf32, #tpu.memory_space<vmem>>, vector<8x128xf32>,
    %223 = vector.shape_cast %218 : vector<8x1xi1> to vector<8x1xi1>
    %224 = vector.broadcast %223 : vector<8x1xi1> to vector<8x128xi1>
    %225 = arith.select %224, %214, %185 : vector<8x128xi1>, vector<8x128xf32>
    %c0_84 = arith.constant 0 : index
    %c0_85 = arith.constant 0 : index
    %226 = vector.load %arg8[%c0_84, %c0_85] : memref<8x128xf32, #tpu.memory_space<vmem>>, vector<8x128xf32>
    tpu.vector_store %arg8[%c0_84, %c0_85], %225 {strides = array<i32>} : memref<8x128xf32, #tpu.memory_space<vmem>>, vector<8x128xf32>,
    %cst_86 = arith.constant 0.000000e+00 : f32
    %227 = vector.shape_cast %218 : vector<8x1xi1> to vector<8x1xi1>
    %228 = vector.broadcast %227 : vector<8x1xi1> to vector<8x128xi1>
    %229 = vector.broadcast %cst_86 : f32 to vector<8x128xf32>
    %230 = arith.select %228, %216, %229 : vector<8x128xi1>, vector<8x128xf32>
    %c0_87 = arith.constant 0 : index
    %231 = arith.index_cast %182 : i32 to index
    %c0_88 = arith.constant 0 : index
    %c0_89 = arith.constant 0 : index
    %232 = vector.load %arg5[%c0_87, %231, %c0_88, %c0_89] : memref<1x8x8x128xf32, #tpu.memory_space<vmem>>, vector<1x1x8x128xf32>
    %233 = vector.shape_cast %232 : vector<1x1x8x128xf32> to vector<8x128xf32>
    %234 = vector.shape_cast %230 : vector<8x128xf32> to vector<1x1x8x128xf32>
    tpu.vector_store %arg5[%c0_87, %231, %c0_88, %c0_89], %234 {strides = array<i32>} : memref<1x8x8x128xf32, #tpu.memory_space<vmem>>, vector<1x1x8x128xf32>,
    %c4_i32 = arith.constant 4 : i32
    %c2_i32_90 = arith.constant 2 : i32
    %235 = arith.muli %c2_i32_90, %c4_i32 : i32
    %c7_i32_91 = arith.constant 7 : i32
    %236 = arith.subi %c7_i32_91, %235 : i32
    %237 = arith.muli %arg0, %236 : i32
    %238 = arith.addi %c4_i32, %237 : i32
    %239 = arith.addi %10, %238 : i32
    %c0_92 = arith.constant 0 : index
    %c0_93 = arith.constant 0 : index
    %240 = vector.load %arg7[%c0_92, %c0_93] : memref<8x128xf32, #tpu.memory_space<vmem>>, vector<8x128xf32>
    %c0_94 = arith.constant 0 : index
    %c0_95 = arith.constant 0 : index
    %241 = vector.load %arg8[%c0_94, %c0_95] : memref<8x128xf32, #tpu.memory_space<vmem>>, vector<8x128xf32>
    %c0_96 = arith.constant 0 : index
    %242 = arith.index_cast %238 : i32 to index
    %c0_97 = arith.constant 0 : index
    %c0_98 = arith.constant 0 : index
    %243 = vector.load %arg2[%c0_96, %242, %c0_97, %c0_98] : memref<1x8x8x512xf32, #tpu.memory_space<vmem>>, vector<1x1x8x512xf32>
    %244 = vector.shape_cast %243 : vector<1x1x8x512xf32> to vector<8x512xf32>
    %245 = arith.truncf %240 : vector<8x128xf32> to vector<8x128xbf16>
    %cst_99 = arith.constant dense<0.000000e+00> : vector<8x512xf32>
    %246 = tpu.matmul %245, %5, %cst_99 {dimension_numbers = #tpu.dot_dimension_numbers<[1], [0], [0], [1], [0, 0, 1, 1], [], []>} : vector<8x128xbf16>, vector<128x512xbf16>, vector<8x512xf32> -> vector<8x512xf32>
    %247 = arith.addf %244, %246 : vector<8x512xf32>
    %248 = vector.extract_strided_slice %247 {offsets = [0, 0], sizes = [8, 128], strides = [1, 1]} : vector<8x512xf32> to vector<8x128xf32>
    %249 = arith.negf %248 : vector<8x128xf32>
    %250 = math.exp %249 : vector<8x128xf32>
    %cst_100 = arith.constant 1.000000e+00 : f32
    %251 = vector.broadcast %cst_100 : f32 to vector<8x128xf32>
    %252 = arith.addf %251, %250 : vector<8x128xf32>
    %253 = arith.divf %251, %252 : vector<8x128xf32>
    %254 = vector.extract_strided_slice %247 {offsets = [0, 128], sizes = [8, 128], strides = [1, 1]} : vector<8x512xf32> to vector<8x128xf32>
    %255 = arith.negf %254 : vector<8x128xf32>
    %256 = math.exp %255 : vector<8x128xf32>
    %cst_101 = arith.constant 1.000000e+00 : f32
    %257 = vector.broadcast %cst_101 : f32 to vector<8x128xf32>
    %258 = arith.addf %257, %256 : vector<8x128xf32>
    %259 = arith.divf %257, %258 : vector<8x128xf32>
    %260 = vector.extract_strided_slice %247 {offsets = [0, 256], sizes = [8, 128], strides = [1, 1]} : vector<8x512xf32> to vector<8x128xf32>
    %261 = math.tanh %260 : vector<8x128xf32>
    %262 = vector.extract_strided_slice %247 {offsets = [0, 384], sizes = [8, 128], strides = [1, 1]} : vector<8x512xf32> to vector<8x128xf32>
    %263 = arith.negf %262 : vector<8x128xf32>
    %264 = math.exp %263 : vector<8x128xf32>
    %cst_102 = arith.constant 1.000000e+00 : f32
    %265 = vector.broadcast %cst_102 : f32 to vector<8x128xf32>
    %266 = arith.addf %265, %264 : vector<8x128xf32>
    %267 = arith.divf %265, %266 : vector<8x128xf32>
    %268 = arith.mulf %259, %241 : vector<8x128xf32>
    %269 = arith.mulf %253, %261 : vector<8x128xf32>
    %270 = arith.addf %268, %269 : vector<8x128xf32>
    %271 = math.tanh %270 : vector<8x128xf32>
    %272 = arith.mulf %267, %271 : vector<8x128xf32>
    %273 = vector.broadcast %239 : i32 to vector<8x1xi32>
    %274 = arith.cmpi slt, %273, %3 : vector<8x1xi32>
    %275 = vector.shape_cast %274 : vector<8x1xi1> to vector<8x1xi1>
    %276 = vector.broadcast %275 : vector<8x1xi1> to vector<8x128xi1>
    %277 = arith.select %276, %272, %240 : vector<8x128xi1>, vector<8x128xf32>
    %c0_103 = arith.constant 0 : index
    %c0_104 = arith.constant 0 : index
    %278 = vector.load %arg7[%c0_103, %c0_104] : memref<8x128xf32, #tpu.memory_space<vmem>>, vector<8x128xf32>
    tpu.vector_store %arg7[%c0_103, %c0_104], %277 {strides = array<i32>} : memref<8x128xf32, #tpu.memory_space<vmem>>, vector<8x128xf32>,
    %279 = vector.shape_cast %274 : vector<8x1xi1> to vector<8x1xi1>
    %280 = vector.broadcast %279 : vector<8x1xi1> to vector<8x128xi1>
    %281 = arith.select %280, %270, %241 : vector<8x128xi1>, vector<8x128xf32>
    %c0_105 = arith.constant 0 : index
    %c0_106 = arith.constant 0 : index
    %282 = vector.load %arg8[%c0_105, %c0_106] : memref<8x128xf32, #tpu.memory_space<vmem>>, vector<8x128xf32>
    tpu.vector_store %arg8[%c0_105, %c0_106], %281 {strides = array<i32>} : memref<8x128xf32, #tpu.memory_space<vmem>>, vector<8x128xf32>,
    %cst_107 = arith.constant 0.000000e+00 : f32
    %283 = vector.shape_cast %274 : vector<8x1xi1> to vector<8x1xi1>
    %284 = vector.broadcast %283 : vector<8x1xi1> to vector<8x128xi1>
    %285 = vector.broadcast %cst_107 : f32 to vector<8x128xf32>
    %286 = arith.select %284, %272, %285 : vector<8x128xi1>, vector<8x128xf32>
    %c0_108 = arith.constant 0 : index
    %287 = arith.index_cast %238 : i32 to index
    %c0_109 = arith.constant 0 : index
    %c0_110 = arith.constant 0 : index
    %288 = vector.load %arg5[%c0_108, %287, %c0_109, %c0_110] : memref<1x8x8x128xf32, #tpu.memory_space<vmem>>, vector<1x1x8x128xf32>
    %289 = vector.shape_cast %288 : vector<1x1x8x128xf32> to vector<8x128xf32>
    %290 = vector.shape_cast %286 : vector<8x128xf32> to vector<1x1x8x128xf32>
    tpu.vector_store %arg5[%c0_108, %287, %c0_109, %c0_110], %290 {strides = array<i32>} : memref<1x8x8x128xf32, #tpu.memory_space<vmem>>, vector<1x1x8x128xf32>,
    %c5_i32 = arith.constant 5 : i32
    %c2_i32_111 = arith.constant 2 : i32
    %291 = arith.muli %c2_i32_111, %c5_i32 : i32
    %c7_i32_112 = arith.constant 7 : i32
    %292 = arith.subi %c7_i32_112, %291 : i32
    %293 = arith.muli %arg0, %292 : i32
    %294 = arith.addi %c5_i32, %293 : i32
    %295 = arith.addi %10, %294 : i32
    %c0_113 = arith.constant 0 : index
    %c0_114 = arith.constant 0 : index
    %296 = vector.load %arg7[%c0_113, %c0_114] : memref<8x128xf32, #tpu.memory_space<vmem>>, vector<8x128xf32>
    %c0_115 = arith.constant 0 : index
    %c0_116 = arith.constant 0 : index
    %297 = vector.load %arg8[%c0_115, %c0_116] : memref<8x128xf32, #tpu.memory_space<vmem>>, vector<8x128xf32>
    %c0_117 = arith.constant 0 : index
    %298 = arith.index_cast %294 : i32 to index
    %c0_118 = arith.constant 0 : index
    %c0_119 = arith.constant 0 : index
    %299 = vector.load %arg2[%c0_117, %298, %c0_118, %c0_119] : memref<1x8x8x512xf32, #tpu.memory_space<vmem>>, vector<1x1x8x512xf32>
    %300 = vector.shape_cast %299 : vector<1x1x8x512xf32> to vector<8x512xf32>
    %301 = arith.truncf %296 : vector<8x128xf32> to vector<8x128xbf16>
    %cst_120 = arith.constant dense<0.000000e+00> : vector<8x512xf32>
    %302 = tpu.matmul %301, %5, %cst_120 {dimension_numbers = #tpu.dot_dimension_numbers<[1], [0], [0], [1], [0, 0, 1, 1], [], []>} : vector<8x128xbf16>, vector<128x512xbf16>, vector<8x512xf32> -> vector<8x512xf32>
    %303 = arith.addf %300, %302 : vector<8x512xf32>
    %304 = vector.extract_strided_slice %303 {offsets = [0, 0], sizes = [8, 128], strides = [1, 1]} : vector<8x512xf32> to vector<8x128xf32>
    %305 = arith.negf %304 : vector<8x128xf32>
    %306 = math.exp %305 : vector<8x128xf32>
    %cst_121 = arith.constant 1.000000e+00 : f32
    %307 = vector.broadcast %cst_121 : f32 to vector<8x128xf32>
    %308 = arith.addf %307, %306 : vector<8x128xf32>
    %309 = arith.divf %307, %308 : vector<8x128xf32>
    %310 = vector.extract_strided_slice %303 {offsets = [0, 128], sizes = [8, 128], strides = [1, 1]} : vector<8x512xf32> to vector<8x128xf32>
    %311 = arith.negf %310 : vector<8x128xf32>
    %312 = math.exp %311 : vector<8x128xf32>
    %cst_122 = arith.constant 1.000000e+00 : f32
    %313 = vector.broadcast %cst_122 : f32 to vector<8x128xf32>
    %314 = arith.addf %313, %312 : vector<8x128xf32>
    %315 = arith.divf %313, %314 : vector<8x128xf32>
    %316 = vector.extract_strided_slice %303 {offsets = [0, 256], sizes = [8, 128], strides = [1, 1]} : vector<8x512xf32> to vector<8x128xf32>
    %317 = math.tanh %316 : vector<8x128xf32>
    %318 = vector.extract_strided_slice %303 {offsets = [0, 384], sizes = [8, 128], strides = [1, 1]} : vector<8x512xf32> to vector<8x128xf32>
    %319 = arith.negf %318 : vector<8x128xf32>
    %320 = math.exp %319 : vector<8x128xf32>
    %cst_123 = arith.constant 1.000000e+00 : f32
    %321 = vector.broadcast %cst_123 : f32 to vector<8x128xf32>
    %322 = arith.addf %321, %320 : vector<8x128xf32>
    %323 = arith.divf %321, %322 : vector<8x128xf32>
    %324 = arith.mulf %315, %297 : vector<8x128xf32>
    %325 = arith.mulf %309, %317 : vector<8x128xf32>
    %326 = arith.addf %324, %325 : vector<8x128xf32>
    %327 = math.tanh %326 : vector<8x128xf32>
    %328 = arith.mulf %323, %327 : vector<8x128xf32>
    %329 = vector.broadcast %295 : i32 to vector<8x1xi32>
    %330 = arith.cmpi slt, %329, %3 : vector<8x1xi32>
    %331 = vector.shape_cast %330 : vector<8x1xi1> to vector<8x1xi1>
    %332 = vector.broadcast %331 : vector<8x1xi1> to vector<8x128xi1>
    %333 = arith.select %332, %328, %296 : vector<8x128xi1>, vector<8x128xf32>
    %c0_124 = arith.constant 0 : index
    %c0_125 = arith.constant 0 : index
    %334 = vector.load %arg7[%c0_124, %c0_125] : memref<8x128xf32, #tpu.memory_space<vmem>>, vector<8x128xf32>
    tpu.vector_store %arg7[%c0_124, %c0_125], %333 {strides = array<i32>} : memref<8x128xf32, #tpu.memory_space<vmem>>, vector<8x128xf32>,
    %335 = vector.shape_cast %330 : vector<8x1xi1> to vector<8x1xi1>
    %336 = vector.broadcast %335 : vector<8x1xi1> to vector<8x128xi1>
    %337 = arith.select %336, %326, %297 : vector<8x128xi1>, vector<8x128xf32>
    %c0_126 = arith.constant 0 : index
    %c0_127 = arith.constant 0 : index
    %338 = vector.load %arg8[%c0_126, %c0_127] : memref<8x128xf32, #tpu.memory_space<vmem>>, vector<8x128xf32>
    tpu.vector_store %arg8[%c0_126, %c0_127], %337 {strides = array<i32>} : memref<8x128xf32, #tpu.memory_space<vmem>>, vector<8x128xf32>,
    %cst_128 = arith.constant 0.000000e+00 : f32
    %339 = vector.shape_cast %330 : vector<8x1xi1> to vector<8x1xi1>
    %340 = vector.broadcast %339 : vector<8x1xi1> to vector<8x128xi1>
    %341 = vector.broadcast %cst_128 : f32 to vector<8x128xf32>
    %342 = arith.select %340, %328, %341 : vector<8x128xi1>, vector<8x128xf32>
    %c0_129 = arith.constant 0 : index
    %343 = arith.index_cast %294 : i32 to index
    %c0_130 = arith.constant 0 : index
    %c0_131 = arith.constant 0 : index
    %344 = vector.load %arg5[%c0_129, %343, %c0_130, %c0_131] : memref<1x8x8x128xf32, #tpu.memory_space<vmem>>, vector<1x1x8x128xf32>
    %345 = vector.shape_cast %344 : vector<1x1x8x128xf32> to vector<8x128xf32>
    %346 = vector.shape_cast %342 : vector<8x128xf32> to vector<1x1x8x128xf32>
    tpu.vector_store %arg5[%c0_129, %343, %c0_130, %c0_131], %346 {strides = array<i32>} : memref<1x8x8x128xf32, #tpu.memory_space<vmem>>, vector<1x1x8x128xf32>,
    %c6_i32 = arith.constant 6 : i32
    %c2_i32_132 = arith.constant 2 : i32
    %347 = arith.muli %c2_i32_132, %c6_i32 : i32
    %c7_i32_133 = arith.constant 7 : i32
    %348 = arith.subi %c7_i32_133, %347 : i32
    %349 = arith.muli %arg0, %348 : i32
    %350 = arith.addi %c6_i32, %349 : i32
    %351 = arith.addi %10, %350 : i32
    %c0_134 = arith.constant 0 : index
    %c0_135 = arith.constant 0 : index
    %352 = vector.load %arg7[%c0_134, %c0_135] : memref<8x128xf32, #tpu.memory_space<vmem>>, vector<8x128xf32>
    %c0_136 = arith.constant 0 : index
    %c0_137 = arith.constant 0 : index
    %353 = vector.load %arg8[%c0_136, %c0_137] : memref<8x128xf32, #tpu.memory_space<vmem>>, vector<8x128xf32>
    %c0_138 = arith.constant 0 : index
    %354 = arith.index_cast %350 : i32 to index
    %c0_139 = arith.constant 0 : index
    %c0_140 = arith.constant 0 : index
    %355 = vector.load %arg2[%c0_138, %354, %c0_139, %c0_140] : memref<1x8x8x512xf32, #tpu.memory_space<vmem>>, vector<1x1x8x512xf32>
    %356 = vector.shape_cast %355 : vector<1x1x8x512xf32> to vector<8x512xf32>
    %357 = arith.truncf %352 : vector<8x128xf32> to vector<8x128xbf16>
    %cst_141 = arith.constant dense<0.000000e+00> : vector<8x512xf32>
    %358 = tpu.matmul %357, %5, %cst_141 {dimension_numbers = #tpu.dot_dimension_numbers<[1], [0], [0], [1], [0, 0, 1, 1], [], []>} : vector<8x128xbf16>, vector<128x512xbf16>, vector<8x512xf32> -> vector<8x512xf32>
    %359 = arith.addf %356, %358 : vector<8x512xf32>
    %360 = vector.extract_strided_slice %359 {offsets = [0, 0], sizes = [8, 128], strides = [1, 1]} : vector<8x512xf32> to vector<8x128xf32>
    %361 = arith.negf %360 : vector<8x128xf32>
    %362 = math.exp %361 : vector<8x128xf32>
    %cst_142 = arith.constant 1.000000e+00 : f32
    %363 = vector.broadcast %cst_142 : f32 to vector<8x128xf32>
    %364 = arith.addf %363, %362 : vector<8x128xf32>
    %365 = arith.divf %363, %364 : vector<8x128xf32>
    %366 = vector.extract_strided_slice %359 {offsets = [0, 128], sizes = [8, 128], strides = [1, 1]} : vector<8x512xf32> to vector<8x128xf32>
    %367 = arith.negf %366 : vector<8x128xf32>
    %368 = math.exp %367 : vector<8x128xf32>
    %cst_143 = arith.constant 1.000000e+00 : f32
    %369 = vector.broadcast %cst_143 : f32 to vector<8x128xf32>
    %370 = arith.addf %369, %368 : vector<8x128xf32>
    %371 = arith.divf %369, %370 : vector<8x128xf32>
    %372 = vector.extract_strided_slice %359 {offsets = [0, 256], sizes = [8, 128], strides = [1, 1]} : vector<8x512xf32> to vector<8x128xf32>
    %373 = math.tanh %372 : vector<8x128xf32>
    %374 = vector.extract_strided_slice %359 {offsets = [0, 384], sizes = [8, 128], strides = [1, 1]} : vector<8x512xf32> to vector<8x128xf32>
    %375 = arith.negf %374 : vector<8x128xf32>
    %376 = math.exp %375 : vector<8x128xf32>
    %cst_144 = arith.constant 1.000000e+00 : f32
    %377 = vector.broadcast %cst_144 : f32 to vector<8x128xf32>
    %378 = arith.addf %377, %376 : vector<8x128xf32>
    %379 = arith.divf %377, %378 : vector<8x128xf32>
    %380 = arith.mulf %371, %353 : vector<8x128xf32>
    %381 = arith.mulf %365, %373 : vector<8x128xf32>
    %382 = arith.addf %380, %381 : vector<8x128xf32>
    %383 = math.tanh %382 : vector<8x128xf32>
    %384 = arith.mulf %379, %383 : vector<8x128xf32>
    %385 = vector.broadcast %351 : i32 to vector<8x1xi32>
    %386 = arith.cmpi slt, %385, %3 : vector<8x1xi32>
    %387 = vector.shape_cast %386 : vector<8x1xi1> to vector<8x1xi1>
    %388 = vector.broadcast %387 : vector<8x1xi1> to vector<8x128xi1>
    %389 = arith.select %388, %384, %352 : vector<8x128xi1>, vector<8x128xf32>
    %c0_145 = arith.constant 0 : index
    %c0_146 = arith.constant 0 : index
    %390 = vector.load %arg7[%c0_145, %c0_146] : memref<8x128xf32, #tpu.memory_space<vmem>>, vector<8x128xf32>
    tpu.vector_store %arg7[%c0_145, %c0_146], %389 {strides = array<i32>} : memref<8x128xf32, #tpu.memory_space<vmem>>, vector<8x128xf32>,
    %391 = vector.shape_cast %386 : vector<8x1xi1> to vector<8x1xi1>
    %392 = vector.broadcast %391 : vector<8x1xi1> to vector<8x128xi1>
    %393 = arith.select %392, %382, %353 : vector<8x128xi1>, vector<8x128xf32>
    %c0_147 = arith.constant 0 : index
    %c0_148 = arith.constant 0 : index
    %394 = vector.load %arg8[%c0_147, %c0_148] : memref<8x128xf32, #tpu.memory_space<vmem>>, vector<8x128xf32>
    tpu.vector_store %arg8[%c0_147, %c0_148], %393 {strides = array<i32>} : memref<8x128xf32, #tpu.memory_space<vmem>>, vector<8x128xf32>,
    %cst_149 = arith.constant 0.000000e+00 : f32
    %395 = vector.shape_cast %386 : vector<8x1xi1> to vector<8x1xi1>
    %396 = vector.broadcast %395 : vector<8x1xi1> to vector<8x128xi1>
    %397 = vector.broadcast %cst_149 : f32 to vector<8x128xf32>
    %398 = arith.select %396, %384, %397 : vector<8x128xi1>, vector<8x128xf32>
    %c0_150 = arith.constant 0 : index
    %399 = arith.index_cast %350 : i32 to index
    %c0_151 = arith.constant 0 : index
    %c0_152 = arith.constant 0 : index
    %400 = vector.load %arg5[%c0_150, %399, %c0_151, %c0_152] : memref<1x8x8x128xf32, #tpu.memory_space<vmem>>, vector<1x1x8x128xf32>
    %401 = vector.shape_cast %400 : vector<1x1x8x128xf32> to vector<8x128xf32>
    %402 = vector.shape_cast %398 : vector<8x128xf32> to vector<1x1x8x128xf32>
    tpu.vector_store %arg5[%c0_150, %399, %c0_151, %c0_152], %402 {strides = array<i32>} : memref<1x8x8x128xf32, #tpu.memory_space<vmem>>, vector<1x1x8x128xf32>,
    %c7_i32_153 = arith.constant 7 : i32
    %c2_i32_154 = arith.constant 2 : i32
    %403 = arith.muli %c2_i32_154, %c7_i32_153 : i32
    %c7_i32_155 = arith.constant 7 : i32
    %404 = arith.subi %c7_i32_155, %403 : i32
    %405 = arith.muli %arg0, %404 : i32
    %406 = arith.addi %c7_i32_153, %405 : i32
    %407 = arith.addi %10, %406 : i32
    %c0_156 = arith.constant 0 : index
    %c0_157 = arith.constant 0 : index
    %408 = vector.load %arg7[%c0_156, %c0_157] : memref<8x128xf32, #tpu.memory_space<vmem>>, vector<8x128xf32>
    %c0_158 = arith.constant 0 : index
    %c0_159 = arith.constant 0 : index
    %409 = vector.load %arg8[%c0_158, %c0_159] : memref<8x128xf32, #tpu.memory_space<vmem>>, vector<8x128xf32>
    %c0_160 = arith.constant 0 : index
    %410 = arith.index_cast %406 : i32 to index
    %c0_161 = arith.constant 0 : index
    %c0_162 = arith.constant 0 : index
    %411 = vector.load %arg2[%c0_160, %410, %c0_161, %c0_162] : memref<1x8x8x512xf32, #tpu.memory_space<vmem>>, vector<1x1x8x512xf32>
    %412 = vector.shape_cast %411 : vector<1x1x8x512xf32> to vector<8x512xf32>
    %413 = arith.truncf %408 : vector<8x128xf32> to vector<8x128xbf16>
    %cst_163 = arith.constant dense<0.000000e+00> : vector<8x512xf32>
    %414 = tpu.matmul %413, %5, %cst_163 {dimension_numbers = #tpu.dot_dimension_numbers<[1], [0], [0], [1], [0, 0, 1, 1], [], []>} : vector<8x128xbf16>, vector<128x512xbf16>, vector<8x512xf32> -> vector<8x512xf32>
    %415 = arith.addf %412, %414 : vector<8x512xf32>
    %416 = vector.extract_strided_slice %415 {offsets = [0, 0], sizes = [8, 128], strides = [1, 1]} : vector<8x512xf32> to vector<8x128xf32>
    %417 = arith.negf %416 : vector<8x128xf32>
    %418 = math.exp %417 : vector<8x128xf32>
    %cst_164 = arith.constant 1.000000e+00 : f32
    %419 = vector.broadcast %cst_164 : f32 to vector<8x128xf32>
    %420 = arith.addf %419, %418 : vector<8x128xf32>
    %421 = arith.divf %419, %420 : vector<8x128xf32>
    %422 = vector.extract_strided_slice %415 {offsets = [0, 128], sizes = [8, 128], strides = [1, 1]} : vector<8x512xf32> to vector<8x128xf32>
    %423 = arith.negf %422 : vector<8x128xf32>
    %424 = math.exp %423 : vector<8x128xf32>
    %cst_165 = arith.constant 1.000000e+00 : f32
    %425 = vector.broadcast %cst_165 : f32 to vector<8x128xf32>
    %426 = arith.addf %425, %424 : vector<8x128xf32>
    %427 = arith.divf %425, %426 : vector<8x128xf32>
    %428 = vector.extract_strided_slice %415 {offsets = [0, 256], sizes = [8, 128], strides = [1, 1]} : vector<8x512xf32> to vector<8x128xf32>
    %429 = math.tanh %428 : vector<8x128xf32>
    %430 = vector.extract_strided_slice %415 {offsets = [0, 384], sizes = [8, 128], strides = [1, 1]} : vector<8x512xf32> to vector<8x128xf32>
    %431 = arith.negf %430 : vector<8x128xf32>
    %432 = math.exp %431 : vector<8x128xf32>
    %cst_166 = arith.constant 1.000000e+00 : f32
    %433 = vector.broadcast %cst_166 : f32 to vector<8x128xf32>
    %434 = arith.addf %433, %432 : vector<8x128xf32>
    %435 = arith.divf %433, %434 : vector<8x128xf32>
    %436 = arith.mulf %427, %409 : vector<8x128xf32>
    %437 = arith.mulf %421, %429 : vector<8x128xf32>
    %438 = arith.addf %436, %437 : vector<8x128xf32>
    %439 = math.tanh %438 : vector<8x128xf32>
    %440 = arith.mulf %435, %439 : vector<8x128xf32>
    %441 = vector.broadcast %407 : i32 to vector<8x1xi32>
    %442 = arith.cmpi slt, %441, %3 : vector<8x1xi32>
    %443 = vector.shape_cast %442 : vector<8x1xi1> to vector<8x1xi1>
    %444 = vector.broadcast %443 : vector<8x1xi1> to vector<8x128xi1>
    %445 = arith.select %444, %440, %408 : vector<8x128xi1>, vector<8x128xf32>
    %c0_167 = arith.constant 0 : index
    %c0_168 = arith.constant 0 : index
    %446 = vector.load %arg7[%c0_167, %c0_168] : memref<8x128xf32, #tpu.memory_space<vmem>>, vector<8x128xf32>
    tpu.vector_store %arg7[%c0_167, %c0_168], %445 {strides = array<i32>} : memref<8x128xf32, #tpu.memory_space<vmem>>, vector<8x128xf32>,
    %447 = vector.shape_cast %442 : vector<8x1xi1> to vector<8x1xi1>
    %448 = vector.broadcast %447 : vector<8x1xi1> to vector<8x128xi1>
    %449 = arith.select %448, %438, %409 : vector<8x128xi1>, vector<8x128xf32>
    %c0_169 = arith.constant 0 : index
    %c0_170 = arith.constant 0 : index
    %450 = vector.load %arg8[%c0_169, %c0_170] : memref<8x128xf32, #tpu.memory_space<vmem>>, vector<8x128xf32>
    tpu.vector_store %arg8[%c0_169, %c0_170], %449 {strides = array<i32>} : memref<8x128xf32, #tpu.memory_space<vmem>>, vector<8x128xf32>,
    %cst_171 = arith.constant 0.000000e+00 : f32
    %451 = vector.shape_cast %442 : vector<8x1xi1> to vector<8x1xi1>
    %452 = vector.broadcast %451 : vector<8x1xi1> to vector<8x128xi1>
    %453 = vector.broadcast %cst_171 : f32 to vector<8x128xf32>
    %454 = arith.select %452, %440, %453 : vector<8x128xi1>, vector<8x128xf32>
    %c0_172 = arith.constant 0 : index
    %455 = arith.index_cast %406 : i32 to index
    %c0_173 = arith.constant 0 : index
    %c0_174 = arith.constant 0 : index
    %456 = vector.load %arg5[%c0_172, %455, %c0_173, %c0_174] : memref<1x8x8x128xf32, #tpu.memory_space<vmem>>, vector<1x1x8x128xf32>
    %457 = vector.shape_cast %456 : vector<1x1x8x128xf32> to vector<8x128xf32>
    %458 = vector.shape_cast %454 : vector<8x128xf32> to vector<1x1x8x128xf32>
    tpu.vector_store %arg5[%c0_172, %455, %c0_173, %c0_174], %458 {strides = array<i32>} : memref<1x8x8x128xf32, #tpu.memory_space<vmem>>, vector<1x1x8x128xf32>,
    %c8_i32_175 = arith.constant 8 : i32
    %c0_i32_176 = arith.constant 0 : i32
    %459 = arith.cmpi eq, %arg1, %c0_i32_176 : i32
    %460 = arith.extui %459 : i1 to i32
    %c0_i32_177 = arith.constant 0 : i32
    %461 = arith.cmpi ne, %460, %c0_i32_177 : i32
    scf.if %461 {
      %c0_178 = arith.constant 0 : index
      %c0_179 = arith.constant 0 : index
      %462 = vector.load %arg7[%c0_178, %c0_179] : memref<8x128xf32, #tpu.memory_space<vmem>>, vector<8x128xf32>
      %c0_180 = arith.constant 0 : index
      %c0_181 = arith.constant 0 : index
      %c0_182 = arith.constant 0 : index
      %463 = vector.load %arg6[%c0_180, %c0_181, %c0_182] : memref<1x8x128xf32, #tpu.memory_space<vmem>>, vector<1x8x128xf32>
      %464 = vector.shape_cast %463 : vector<1x8x128xf32> to vector<8x128xf32>
      %465 = vector.shape_cast %462 : vector<8x128xf32> to vector<1x8x128xf32>
      tpu.vector_store %arg6[%c0_180, %c0_181, %c0_182], %465 {strides = array<i32>} : memref<1x8x128xf32, #tpu.memory_space<vmem>>, vector<1x8x128xf32>,
    } else {
    }
    return
  }
  func.func @transform_0(%arg0: i32, %arg1: i32) -> (i32, i32, i32, i32) {
    %c2_i32 = arith.constant 2 : i32
    %0 = arith.muli %c2_i32, %arg1 : i32
    %c0_i32 = arith.constant 0 : i32
    %1 = arith.subi %c0_i32, %0 : i32
    %2 = arith.muli %arg0, %1 : i32
    %3 = arith.addi %arg1, %2 : i32
    %c0_i32_0 = arith.constant 0 : i32
    %c0_i32_1 = arith.constant 0 : i32
    %c0_i32_2 = arith.constant 0 : i32
    return %arg0, %3, %c0_i32_0, %c0_i32_1 : i32, i32, i32, i32
  }
  func.func @transform_1(%arg0: i32, %arg1: i32) -> (i32, i32, i32) {
    %c0_i32 = arith.constant 0 : i32
    %c0_i32_0 = arith.constant 0 : i32
    %c0_i32_1 = arith.constant 0 : i32
    return %arg0, %c0_i32, %c0_i32_0 : i32, i32, i32
  }
  func.func @transform_2(%arg0: i32, %arg1: i32) -> (i32, i32) {
    %c0_i32 = arith.constant 0 : i32
    %c0_i32_0 = arith.constant 0 : i32
    %c0_i32_1 = arith.constant 0 : i32
    return %c0_i32, %c0_i32_0 : i32, i32
  }
  func.func @transform_3(%arg0: i32, %arg1: i32) -> (i32, i32, i32, i32) {
    %c2_i32 = arith.constant 2 : i32
    %0 = arith.muli %c2_i32, %arg1 : i32
    %c0_i32 = arith.constant 0 : i32
    %1 = arith.subi %c0_i32, %0 : i32
    %2 = arith.muli %arg0, %1 : i32
    %3 = arith.addi %arg1, %2 : i32
    %c0_i32_0 = arith.constant 0 : i32
    %c0_i32_1 = arith.constant 0 : i32
    %c0_i32_2 = arith.constant 0 : i32
    return %arg0, %3, %c0_i32_0, %c0_i32_1 : i32, i32, i32, i32
  }
  func.func @transform_4(%arg0: i32, %arg1: i32) -> (i32, i32, i32) {
    %c0_i32 = arith.constant 0 : i32
    %c0_i32_0 = arith.constant 0 : i32
    %c0_i32_1 = arith.constant 0 : i32
    return %arg0, %c0_i32, %c0_i32_0 : i32, i32, i32
  }
}

</mosaic_0001>

<bundles_post_ra>
// kernel: lstm_encoder_forward.1
= control target key start
LH: loop header
LB: loop body
LE: loop exit
PB: predicated region body
PF: predicated region fallthrough
CT: control target
= control target key end

     0   :  { %s2245_s15 = smov 0   ;;  %s2247_s16 = smov 0   ;;  %s2884_s0 = inlined_call_operand.vmem [shape: f32[2,8,8,512], index: 0, kind: input, shape index: {}]   ;;  %s2885_s1 = inlined_call_operand.vmem [shape: bf16[2,128,512], index: 1, kind: input, shape index: {}]   ;;  %s2886_s2 = inlined_call_operand.vmem [shape: s32[8,1], index: 2, kind: input, shape index: {}]   ;;  %s2887_s3 = inlined_call_operand.vmem [shape: f32[2,8,8,128], index: 3, kind: output, shape index: {0}]   ;;  %s2888_s4 = inlined_call_operand.vmem [shape: f32[2,8,128], index: 4, kind: output, shape index: {1}]  }
   0x1   :  { %s2249_s17 = smov 0  }
   0x2 LB: > { %s27_s18 = sadd.s32 1, %s2212_s16  ;;  %p1833_p0 = scmp.ge.s32.totalorder %s2216_s17, 1  ;;  %s2216_s17 = sphi %s2249_s17, %s15_s17   ;;  %s2212_s16 = sphi %s2247_s16, %s2890_s16   ;;  %s2208_s15 = sphi %s2245_s15, %s2889_s15  }
   0x3   : > { %p29_p1 = scmp.ge.s32.totalorder %s27_s18, 2  ;;  %p221_p2 = scmp.lt.s32.totalorder %s2216_s17, 3 }
   0x5   : > { %s2892_s18 = smov (%p29_p1, %s27_s18), 0  ;;  %p222_p3 = pnand %p1833_p0, %p221_p2 }
   0x6   : > { %p278_p4 = scmp.lt.s32.totalorder (!%p222_p3), %s2208_s15, 1  ;;  %v2269_v0 = vld [vmem:[%s2886_s2] sm:$0xff] (!%p222_p3)  ;;  %s364_s21 = smul.u32 (!%p222_p3), 7, %s2208_s15  ;;  %v2218_v1 = vmov (!%p222_p3), 0   ;;  %v2219_v42 = vmov (!%p222_p3), 0.0|0.0  }
   0x7   : > { %225 = sbr.rel (%p222_p3) target bundleno = 2137 (0x859), region = 32  ;;  %568 = vmatprep.mubr.bf16.mxu0 (!%p222_p3), %v2218_v1  ;;  %609 = vmatprep.mubr.bf16.mxu1 (!%p222_p3), %v2218_v1  ;;  %s2282_s25 = ssub.s32 (!%p222_p3), 4, %s2208_s15 }
   0x8   : > { %s661_s22 = smul.u32 (!%p222_p3), 5, %s2208_s15  ;;  %1984 = vset.pattern.permute.xlu0 (!%p222_p3), %v2218_v1  ;;  %v646_v2 = vstv (!%p222_p3), %s364_s21  ;;  %1985 = vset.pattern.permute.xlu1 (!%p222_p3), %v2218_v1  ;;  %v1196_v7 = vstv (!%p222_p3), %s2282_s25  ;;  %s1899_s14 = sshll.u32 (!%p222_p3), %s2208_s15, 5 }
   0x9   : > { %vm647_vm0 = vcmp.lt.s32.totalorder (!%p222_p3), %v646_v2, %v2269_v0  ;;  %s1349_s30 = smul.u32 (!%p222_p3), 4294967291, %s2208_s15  ;;  %vm1197_vm2 = vcmp.lt.s32.totalorder (!%p222_p3), %v1196_v7, %v2269_v0 }
   0xa   : > { %s662_s24 = sadd.s32 (!%p222_p3), 1, %s661_s22  ;;  %v648_v3 = vsel (!%p222_p3), %vm647_vm0, 1, %v2218_v1  ;;  %v1198_v15 = vsel (!%p222_p3), %vm1197_vm2, 1, %v2218_v1  ;;  %s1950_s6 = smul.u32 (!%p222_p3), 224, %s2208_s15 }
   0xb   : > { %v784_v4 = vstv (!%p222_p3), %s662_s24  ;;  %650 = vperm.xlu0 (!%p222_p3), %1984, %v648_v3   ;;  %s1350_s5 = sadd.s32 (!%p222_p3), 6, %s1349_s30  ;;  %s1878_s12 = smul.u32 (!%p222_p3), 56, %s2208_s15 }
   0xc   : > { %vm785_vm1 = vcmp.lt.s32.totalorder (!%p222_p3), %v784_v4, %v2269_v0  ;;  %v1472_v12 = vstv (!%p222_p3), %s1350_s5  ;;  %s799_s21 = smul.u32 (!%p222_p3), 3, %s2208_s15  ;;  %s937_s22 = sadd.s32 (!%p222_p3), 3, %s2208_s15 }
   0xd   : > { %v786_v6 = vsel (!%p222_p3), %vm785_vm1, 1, %v2218_v1  ;;  %vm1473_vm3 = vcmp.lt.s32.totalorder (!%p222_p3), %v1472_v12, %v2269_v0  ;;  %s1211_s24 = smul.u32 (!%p222_p3), 4294967293, %s2208_s15 }
   0xe   : > { %s2276_s23 = scalar_select %p278_p4, %s2208_s15, 1  ;;  %v1474_v20 = vsel %vm1473_vm3, 1, %v2218_v1 }
   0xf   : > { %788 = vperm.xlu0 %1984, %v786_v6   ;;  %s1487_s27 = smul.u32 4294967289, %s2208_s15  ;;  %s1212_s28 = sadd.s32 5, %s1211_s24 }
  0x10   : > { %s1947_s26 = sshll.u32 %s2276_s23, 8  ;;  %s1949_s11 = sshll.u32 %s2276_s23, 6 }
  0x11   : > { %s2291_s29 = scalar_lea.vmem %s2885_s1, %s1947_s26  ;;  %s2471_s9 = scalar_lea.vmem %s2884_s0, %s1947_s26 }
  0x12   : > { %v2295_v5 = vld [vmem:[%s2291_s29 + $0x4] ss:$16 sps:$4 sm:$0xff]   ;;  %v2300_v8 = vld [vmem:[%s2291_s29] ss:$16 sps:$4 sm:$0xff]   ;;  %v2317_v13 = vld [vmem:[%s2291_s29 + $0xc] ss:$16 sps:$4 sm:$0xff]   ;;  %s370_s10 = scalar_lea.vmem %s2471_s9, %s1950_s6  ;;  %s2482_s19 = scalar_lea.vmem %s2887_s3, %s1949_s11 }
  0x13   : > { %536 = vmatprep.subr.bf16.mxu0 %v2295_v5  ;;  %v2305_v9 = vld [vmem:[%s2291_s29 + $0x24] ss:$16 sps:$4 sm:$0xff]   ;;  %v2309_v10 = vld [vmem:[%s2291_s29 + $0x20] ss:$16 sps:$4 sm:$0xff]   ;;  %v2320_v14 = vld [vmem:[%s2291_s29 + $0x8] ss:$16 sps:$4 sm:$0xff]   ;;  %577 = vmatprep.subr.bf16.mxu1 %v2317_v13  ;;  %s659_s20 = scalar_lea.vmem %s2482_s19, %s1878_s12 }
  0x14   : > { %537 = vmatpush1.bf16.msra.mxu0 %v2300_v8  ;;  %v2314_v11 = vld [vmem:[%s2291_s29 + $0x44] ss:$16 sps:$4 sm:$0xff]   ;;  %v2325_v16 = vld [vmem:[%s2291_s29 + $0x40] ss:$16 sps:$4 sm:$0xff]   ;;  %578 = vmatpush1.bf16.msra.mxu1 %v2320_v14  ;;  %v2335_v18 = vld [vmem:[%s2291_s29 + $0x2c] ss:$16 sps:$4 sm:$0xff]  }
  0x15   : > { %538 = vmatprep.subr.bf16.mxu0 %v2305_v9  ;;  %v2331_v17 = vld [vmem:[%s2291_s29 + $0x64] ss:$16 sps:$4 sm:$0xff]   ;;  %v2338_v19 = vld [vmem:[%s2291_s29 + $0x28] ss:$16 sps:$4 sm:$0xff]   ;;  %1200 = vperm.xlu0 %1984, %v1198_v15   ;;  %v2344_v21 = vld [vmem:[%s2291_s29 + $0x60] ss:$16 sps:$4 sm:$0xff]  }
  0x16   : > { %579 = vmatprep.subr.bf16.mxu1 %v2335_v18  ;;  %v2347_v22 = vld [vmem:[%s2291_s29 + $0x84] ss:$16 sps:$4 sm:$0xff]   ;;  %v2350_v23 = vld [vmem:[%s2291_s29 + $0x4c] ss:$16 sps:$4 sm:$0xff]   ;;  %v2355_v24 = vld [vmem:[%s2291_s29 + $0x48] ss:$16 sps:$4 sm:$0xff]  }
  0x17   : > { %v2359_v25 = vld [vmem:[%s2291_s29 + $0x6c] ss:$16 sps:$4 sm:$0xff]   ;;  %v2363_v26 = vld [vmem:[%s2291_s29 + $0x80] ss:$16 sps:$4 sm:$0xff]   ;;  %v2367_v27 = vld [vmem:[%s2291_s29 + $0xa4] ss:$16 sps:$4 sm:$0xff]  }
  0x18   : > { %539 = vmatpush1.bf16.msra.mxu0 %v2309_v10  ;;  %580 = vmatpush1.bf16.msra.mxu1 %v2338_v19  ;;  %v2371_v28 = vld [vmem:[%s2291_s29 + $0x68] ss:$16 sps:$4 sm:$0xff]   ;;  %v2375_v29 = vld [vmem:[%s2291_s29 + $0x8c] ss:$16 sps:$4 sm:$0xff]   ;;  %v2379_v30 = vld [vmem:[%s2291_s29 + $0xa0] ss:$16 sps:$4 sm:$0xff]  }
  0x19   : > { %540 = vmatprep.subr.bf16.mxu0 %v2314_v11  ;;  %581 = vmatprep.subr.bf16.mxu1 %v2350_v23  ;;  %v2382_v31 = vld [vmem:[%s2291_s29 + $0xc4] ss:$16 sps:$4 sm:$0xff]   ;;  %v2387_v32 = vld [vmem:[%s2291_s29 + $0x88] ss:$16 sps:$4 sm:$0xff]   ;;  %v2391_v33 = vld [vmem:[%s2291_s29 + $0xac] ss:$16 sps:$4 sm:$0xff]  }
  0x1a   : > { %1476 = vperm.xlu0 %1984, %v1474_v20   ;;  %v2395_v34 = vld [vmem:[%s2291_s29 + $0xc0] ss:$16 sps:$4 sm:$0xff]   ;;  %v2399_v35 = vld [vmem:[%s2291_s29 + $0xe4] ss:$16 sps:$4 sm:$0xff]   ;;  %v2403_v36 = vld [vmem:[%s2291_s29 + $0xa8] ss:$16 sps:$4 sm:$0xff]  }
  0x1b   : > { %v2407_v37 = vld [vmem:[%s2291_s29 + $0xcc] ss:$16 sps:$4 sm:$0xff]   ;;  %v2411_v38 = vld [vmem:[%s2291_s29 + $0xe0] ss:$16 sps:$4 sm:$0xff]   ;;  %v2416_v39 = vld [vmem:[%s2291_s29 + $0xc8] ss:$16 sps:$4 sm:$0xff]  }
  0x1c   : > { %541 = vmatpush1.bf16.msra.mxu0 %v2325_v16  ;;  %582 = vmatpush1.bf16.msra.mxu1 %v2355_v24  ;;  %v2420_v40 = vld [vmem:[%s2291_s29 + $0xec] ss:$16 sps:$4 sm:$0xff]   ;;  %v2425_v41 = vld [vmem:[%s2291_s29 + $0xe8] ss:$16 sps:$4 sm:$0xff]   ;;  %v371_v43 = vld [vmem:[%s370_s10] sm:$0xff]  ;;  %s800_s26 = sadd.s32 2, %s799_s21 }
  0x1d   : > { %542 = vmatprep.subr.bf16.mxu0 %v2331_v17  ;;  %583 = vmatprep.subr.bf16.mxu1 %v2359_v25  ;;  %v372_v44 = vld [vmem:[%s370_s10 + $0x8] sm:$0xff]  ;;  %v374_v53 = vld [vmem:[%s370_s10 + $0x18] sm:$0xff]  ;;  %v373_v59 = vld [vmem:[%s370_s10 + $0x10] sm:$0xff]  ;;  %s1488_s30 = sadd.s32 7, %s1487_s27  ;;  %s1879_s5 = smul.u32 160, %s2208_s15 }
  0x1e   : > { %s1887_s7 = smul.u32 40, %s2208_s15  ;;  %s1907_s21 = sshll.u32 %s2208_s15, 3 }
  0x1f   : > { %s1725_s6 = scalar_lea.vmem %s2471_s9, %s1879_s5  ;;  %s1889_s10 = smul.u32 96, %s2208_s15 }
  0x20   : > { %543 = vmatpush1.bf16.msra.mxu0 %v2344_v21  ;;  %584 = vmatpush1.bf16.msra.mxu1 %v2371_v28  ;;  %s1729_s8 = scalar_lea.vmem %s2482_s19, %s1887_s7  ;;  %s1897_s12 = smul.u32 24, %s2208_s15 }
  0x21   : > { %544 = vmatprep.subr.bf16.mxu0 %v2347_v22  ;;  %585 = vmatprep.subr.bf16.mxu1 %v2375_v29  ;;  %s1733_s11 = scalar_lea.vmem %s2471_s9, %s1889_s10  ;;  %s1951_s24 = sshll.u32 %s2282_s25, 5 }
  0x22   : > { %s1737_s13 = scalar_lea.vmem %s2482_s19, %s1897_s12  ;;  %s1914_s27 = sshll.u32 %s2282_s25, 3 }
  0x23   : > { %s1915_s25 = smul.u32 4294967200, %s2208_s15 }
  0x24   : > { %545 = vmatpush1.bf16.msra.mxu0 %v2363_v26  ;;  %586 = vmatpush1.bf16.msra.mxu1 %v2387_v32  ;;  %s1923_s5 = smul.u32 4294967272, %s2208_s15 }
  0x25   : > { %546 = vmatprep.subr.bf16.mxu0 %v2367_v27  ;;  %587 = vmatprep.subr.bf16.mxu1 %v2391_v33  ;;  %s1925_s7 = smul.u32 4294967136, %s2208_s15 }
  0x28   : > { %547 = vmatpush1.bf16.msra.mxu0 %v2379_v30  ;;  %588 = vmatpush1.bf16.msra.mxu1 %v2403_v36 }
  0x29   : > { %548 = vmatprep.subr.bf16.mxu0 %v2382_v31  ;;  %589 = vmatprep.subr.bf16.mxu1 %v2407_v37 }
  0x2c   : > { %549 = vmatpush1.bf16.msra.mxu0 %v2395_v34  ;;  %590 = vmatpush1.bf16.msra.mxu1 %v2416_v39 }
  0x2d   : > { %550 = vmatprep.subr.bf16.mxu0 %v2399_v35  ;;  %591 = vmatprep.subr.bf16.mxu1 %v2420_v40 }
  0x30   : > { %551 = vmatpush1.bf16.msra.mxu0 %v2411_v38  ;;  %592 = vmatpush1.bf16.msra.mxu1 %v2425_v41 }
  0x31   : > { %674 = vmatprep.subr.bf16.mxu0 %v2295_v5  ;;  %715 = vmatprep.subr.bf16.mxu1 %v2317_v13 }
  0x33   : > { %569 = vmatmul.mubr.bf16.vlgmr.msra.gmra.mrb[0].mxu0 %v2219_v42  ;;  %610 = vmatmul.mubr.bf16.vlgmr.msra.gmra.mrb[0].mxu1 %v2219_v42 }
  0x34   : > { %675 = vmatpush1.bf16.msra.mxu0 %v2300_v8  ;;  %706 = vmatprep.mubr.bf16.mxu0 %v2218_v1 }
  0x35   : > { %676 = vmatprep.subr.bf16.mxu0 %v2305_v9  ;;  %716 = vmatpush1.bf16.msra.mxu1 %v2320_v14 }
  0x36   : > { %717 = vmatprep.subr.bf16.mxu1 %v2335_v18  ;;  %747 = vmatprep.mubr.bf16.mxu1 %v2218_v1 }
  0x38   : > { %677 = vmatpush1.bf16.msra.mxu0 %v2309_v10 }
  0x39   : > { %678 = vmatprep.subr.bf16.mxu0 %v2314_v11  ;;  %718 = vmatpush1.bf16.msra.mxu1 %v2338_v19 }
  0x3a   : > { %719 = vmatprep.subr.bf16.mxu1 %v2350_v23 }
  0x3c   : > { %679 = vmatpush1.bf16.msra.mxu0 %v2325_v16 }
  0x3d   : > { %680 = vmatprep.subr.bf16.mxu0 %v2331_v17  ;;  %720 = vmatpush1.bf16.msra.mxu1 %v2355_v24 }
  0x3e   : > { %721 = vmatprep.subr.bf16.mxu1 %v2359_v25 }
  0x40   : > { %681 = vmatpush1.bf16.msra.mxu0 %v2344_v21 }
  0x41   : > { %682 = vmatprep.subr.bf16.mxu0 %v2347_v22  ;;  %722 = vmatpush1.bf16.msra.mxu1 %v2371_v28 }
  0x42   : > { %723 = vmatprep.subr.bf16.mxu1 %v2375_v29 }
  0x44   : > { %683 = vmatpush1.bf16.msra.mxu0 %v2363_v26 }
  0x45   : > { %684 = vmatprep.subr.bf16.mxu0 %v2367_v27  ;;  %724 = vmatpush1.bf16.msra.mxu1 %v2387_v32 }
  0x46   : > { %725 = vmatprep.subr.bf16.mxu1 %v2391_v33 }
  0x48   : > { %685 = vmatpush1.bf16.msra.mxu0 %v2379_v30 }
  0x49   : > { %686 = vmatprep.subr.bf16.mxu0 %v2382_v31  ;;  %726 = vmatpush1.bf16.msra.mxu1 %v2403_v36 }
  0x4a   : > { %727 = vmatprep.subr.bf16.mxu1 %v2407_v37 }
  0x4c   : > { %687 = vmatpush1.bf16.msra.mxu0 %v2395_v34 }
  0x4d   : > { %688 = vmatprep.subr.bf16.mxu0 %v2399_v35  ;;  %728 = vmatpush1.bf16.msra.mxu1 %v2416_v39 }
  0x4e   : > { %729 = vmatprep.subr.bf16.mxu1 %v2420_v40 }
  0x50   : > { %689 = vmatpush1.bf16.msra.mxu0 %v2411_v38 }
  0x51   : > { %812 = vmatprep.subr.bf16.mxu0 %v2295_v5  ;;  %730 = vmatpush1.bf16.msra.mxu1 %v2425_v41 }
  0x52   : > { %853 = vmatprep.subr.bf16.mxu1 %v2317_v13 }
 0x106   : > { %v570_v45 = vpop.f32.mrb[0].mxu0  ;;  %v611_v54 = vpop.f32.mrb[0].mxu1 }
 0x107   : > { %v618_v46 = vadd.f32 %v570_v45, %v371_v43  ;;  %v572_v47 = vpop.f32.mrb[1].mxu0  ;;  %v613_v55 = vpop.f32.mrb[1].mxu1  ;;  %v620_v61 = vadd.f32 %v611_v54, %v373_v59  ;;  %v1881_v59 = vld [vmem:[%s1725_s6 + $0x28] sm:$0xff] }
 0x108   : > { %v619_v48 = vadd.f32 %v572_v47, %v372_v44  ;;  %v574_v49 = vpop.f32.mrb[2].mxu0  ;;  %v621_v56 = vadd.f32 %v613_v55, %v374_v53  ;;  %v615_v57 = vpop.f32.mrb[2].mxu1  ;;  %v1334_v53 = vstv %s1212_s28  ;;  %v1610_v55 = vstv %s1488_s30  ;;  %s1209_s28 = scalar_lea.vmem %s2482_s19, %s1914_s27  ;;  %s1751_s30 = scalar_lea.vmem %s2471_s9, %s1915_s25 }
 0x109   : > { %v1875_v50 = vmul.f32 -1.442695, %v618_v46  ;;  %v575_v51 = vpop.f32.mrb[3].mxu0  ;;  %v616_v58 = vpop.f32.mrb[3].mxu1  ;;  %vm1335_vm8 = vcmp.lt.s32.totalorder %v1334_v53, %v2269_v0  ;;  %vm1611_vm9 = vcmp.lt.s32.totalorder %v1610_v55, %v2269_v0 }
 0x10a   : > { %v1876_v52 = vmul.f32 -1.442695, %v619_v48  ;;  %v1877_v60 = vmul.f32 -1.442695, %v621_v56  ;;  %v2484_v45 = vpop.permute.xlu0 %650  ;;  %v922_v51 = vstv %s800_s26  ;;  %v1336_v56 = vsel %vm1335_vm8, 1, %v2218_v1  ;;  %v1880_v58 = vld [vmem:[%s1725_s6 + $0x20] sm:$0xff]  ;;  %s1080_s26 = scalar_lea.vmem %s2471_s9, %s1951_s24 }
 0x10b   : > { %2034 = vpow2.f32 %v1875_v50  ;;  %vm652_vm4 = vcmp.eq.s32.totalorder %v2484_v45, 1  ;;  %v1059_v50 = vstv %s937_s22  ;;  %vm923_vm6 = vcmp.lt.s32.totalorder %v922_v51, %v2269_v0  ;;  %s1743_s22 = scalar_lea.vmem %s2482_s19, %s1907_s21 }
 0x10c   : > { %2036 = vpow2.f32 %v1876_v52  ;;  %vm1952_vm5 = vmpackc.low %vm652_vm4, %vm652_vm4  ;;  %vm1060_vm7 = vcmp.lt.s32.totalorder %v1059_v50, %v2269_v0  ;;  %v924_v52 = vsel %vm923_vm6, 1, %v2218_v1  ;;  %v1612_v57 = vsel %vm1611_vm9, 1, %v2218_v1 }
 0x10d   : > { %2038 = vpow2.f32 %v1877_v60  ;;  %926 = vperm.xlu1 %1985, %v924_v52   ;;  %v1061_v54 = vsel %vm1060_vm7, 1, %v2218_v1 }
 0x10e   : > { %2040 = vtanh.f32 %v620_v61 }
 0x111   : > { %1063 = vperm.xlu1 %1985, %v1061_v54  }
 0x115   : > { %v2035_v62 = vpop.eup %2034  ;;  %1338 = vperm.xlu1 %1985, %v1336_v56  }
 0x116   : > { %v2037_v63 = vpop.eup %2036  ;;  %v625_v2 = vadd.f32 1.0, %v2035_v62 }
 0x117   : > { %v631_v3 = vadd.f32 1.0, %v2037_v63  ;;  %v2039_v4 = vpop.eup %2038 }
 0x118   : > { %2042 = vrcp.f32 %v625_v2  ;;  %v2041_v6 = vpop.eup %2040  ;;  %v638_v12 = vadd.f32 1.0, %v2039_v4 }
 0x119   : > { %2044 = vrcp.f32 %v631_v3  ;;  %1614 = vperm.xlu1 %1985, %v1612_v57  }
 0x11a   : > { %2046 = vrcp.f32 %v638_v12 }
 0x122   : > { %v2043_v7 = vpop.eup %2042 }
 0x123   : > { %v2045_v15 = vpop.eup %2044  ;;  %v642_v20 = vmul.f32 %v2043_v7, %v2041_v6 }
 0x124   : > { %v641_v42 = vmul.f32 0.0, %v2045_v15  ;;  %v2047_v44 = vpop.eup %2046 }
 0x126   : > { %v2474_v43 = vadd.f32 %v642_v20, %v641_v42  ;;  %v1883_v20 = vld [vmem:[%s1725_s6 + $0x38] sm:$0xff] }
 0x128   : > { %2048 = vtanh.f32 %v2474_v43  ;;  %v655_v57 = vsel %vm652_vm4, %v2474_v43, 0.0 }
 0x132   : > { %v2049_v46 = vpop.eup %2048 }
 0x133   : > { %v645_v47 = vmul.f32 %v2049_v46, %v2047_v44  ;;  %v1882_v44 = vld [vmem:[%s1725_s6 + $0x30] sm:$0xff]  ;;  %s1755_s6 = scalar_lea.vmem %s2482_s19, %s1923_s5 }
 0x135   : > { %v2493_v48 = vsel %vm652_vm4, %v645_v47, 0.0  ;;  %v1953_v49 = vpack.c.bf16 %v645_v47, %v645_v47 }
 0x136   : > { %660 = vst [vmem:[%s659_s20] sm:$0xff] %v2493_v48  ;;  %s1740_s20 = scalar_lea.vmem %s2471_s9, %s1899_s14 }
 0x137   : > { %1954 = vmatmul.mubr.msk.bf16.vlgmr.msra.gmra.mrb[4].mxu0 %vm1952_vm5, %v1953_v49  ;;  %1957 = vmatmul.mubr.msk.bf16.vlgmr.msra.gmra.mrb[4].mxu1 %vm1952_vm5, %v1953_v49 }
 0x138   : > { %813 = vmatpush1.bf16.msra.mxu0 %v2300_v8  ;;  %854 = vmatpush1.bf16.msra.mxu1 %v2320_v14 }
 0x139   : > { %814 = vmatprep.subr.bf16.mxu0 %v2305_v9  ;;  %855 = vmatprep.subr.bf16.mxu1 %v2335_v18 }
 0x13a   : > { %844 = vmatprep.mubr.bf16.mxu0 %v2218_v1  ;;  %885 = vmatprep.mubr.bf16.mxu1 %v2218_v1 }
 0x13c   : > { %815 = vmatpush1.bf16.msra.mxu0 %v2309_v10  ;;  %856 = vmatpush1.bf16.msra.mxu1 %v2338_v19 }
 0x13d   : > { %816 = vmatprep.subr.bf16.mxu0 %v2314_v11  ;;  %857 = vmatprep.subr.bf16.mxu1 %v2350_v23 }
 0x140   : > { %817 = vmatpush1.bf16.msra.mxu0 %v2325_v16  ;;  %858 = vmatpush1.bf16.msra.mxu1 %v2355_v24 }
 0x141   : > { %818 = vmatprep.subr.bf16.mxu0 %v2331_v17  ;;  %859 = vmatprep.subr.bf16.mxu1 %v2359_v25 }
 0x144   : > { %819 = vmatpush1.bf16.msra.mxu0 %v2344_v21  ;;  %860 = vmatpush1.bf16.msra.mxu1 %v2371_v28 }
 0x145   : > { %820 = vmatprep.subr.bf16.mxu0 %v2347_v22  ;;  %861 = vmatprep.subr.bf16.mxu1 %v2375_v29 }
 0x148   : > { %821 = vmatpush1.bf16.msra.mxu0 %v2363_v26  ;;  %862 = vmatpush1.bf16.msra.mxu1 %v2387_v32 }
 0x149   : > { %822 = vmatprep.subr.bf16.mxu0 %v2367_v27  ;;  %863 = vmatprep.subr.bf16.mxu1 %v2391_v33 }
 0x14c   : > { %823 = vmatpush1.bf16.msra.mxu0 %v2379_v30  ;;  %864 = vmatpush1.bf16.msra.mxu1 %v2403_v36 }
 0x14d   : > { %824 = vmatprep.subr.bf16.mxu0 %v2382_v31  ;;  %865 = vmatprep.subr.bf16.mxu1 %v2407_v37 }
 0x150   : > { %825 = vmatpush1.bf16.msra.mxu0 %v2395_v34  ;;  %866 = vmatpush1.bf16.msra.mxu1 %v2416_v39 }
 0x151   : > { %826 = vmatprep.subr.bf16.mxu0 %v2399_v35  ;;  %867 = vmatprep.subr.bf16.mxu1 %v2420_v40 }
 0x154   : > { %827 = vmatpush1.bf16.msra.mxu0 %v2411_v38  ;;  %868 = vmatpush1.bf16.msra.mxu1 %v2425_v41 }
 0x155   : > { %949 = vmatprep.subr.bf16.mxu0 %v2295_v5  ;;  %990 = vmatprep.subr.bf16.mxu1 %v2317_v13 }
 0x20a   : > { %v708_v60 = vpop.f32.mrb[4].mxu0  ;;  %v749_v61 = vpop.f32.mrb[4].mxu1 }
 0x20b   : > { %v756_v62 = vadd.f32 %v1880_v58, %v708_v60  ;;  %v710_v63 = vpop.f32.mrb[5].mxu0  ;;  %v751_v2 = vpop.f32.mrb[5].mxu1  ;;  %v758_v47 = vadd.f32 %v1882_v44, %v749_v61 }
 0x20c   : > { %v757_v3 = vadd.f32 %v1881_v59, %v710_v63  ;;  %v712_v4 = vpop.f32.mrb[6].mxu0  ;;  %v753_v6 = vpop.f32.mrb[6].mxu1  ;;  %v759_v42 = vadd.f32 %v1883_v20, %v751_v2 }
 0x20d   : > { %v1884_v7 = vmul.f32 -1.442695, %v756_v62  ;;  %v713_v12 = vpop.f32.mrb[7].mxu0  ;;  %v754_v15 = vpop.f32.mrb[7].mxu1 }
 0x20e   : > { %v1885_v0 = vmul.f32 -1.442695, %v757_v3  ;;  %v1886_v46 = vmul.f32 -1.442695, %v759_v42  ;;  %v789_v61 = vpop.permute.xlu0 %788 }
 0x20f   : > { %2050 = vpow2.f32 %v1884_v7  ;;  %vm790_vm10 = vcmp.eq.s32.totalorder %v789_v61, 1  ;;  %v1891_v7 = vld [vmem:[%s1733_s11 + $0x48] sm:$0xff] }
 0x210   : > { %2052 = vpow2.f32 %v1885_v0 }
 0x211   : > { %2054 = vpow2.f32 %v1886_v46 }
 0x212   : > { %2056 = vtanh.f32 %v758_v47 }
 0x219   : > { %v2051_v49 = vpop.eup %2050 }
 0x21a   : > { %v2053_v50 = vpop.eup %2052  ;;  %v763_v51 = vadd.f32 1.0, %v2051_v49 }
 0x21b   : > { %v769_v52 = vadd.f32 1.0, %v2053_v50  ;;  %v2055_v53 = vpop.eup %2054 }
 0x21c   : > { %2058 = vrcp.f32 %v763_v51  ;;  %v2057_v54 = vpop.eup %2056  ;;  %v776_v59 = vadd.f32 1.0, %v2055_v53  ;;  %v1893_v53 = vld [vmem:[%s1733_s11 + $0x58] sm:$0xff] }
 0x21d   : > { %2060 = vrcp.f32 %v769_v52 }
 0x21e   : > { %2062 = vrcp.f32 %v776_v59 }
 0x226   : > { %v2059_v55 = vpop.eup %2058 }
 0x227   : > { %v2061_v56 = vpop.eup %2060  ;;  %v780_v58 = vmul.f32 %v2059_v55, %v2057_v54  ;;  %v1892_v55 = vld [vmem:[%s1733_s11 + $0x50] sm:$0xff] }
 0x228   : > { %v779_v60 = vmul.f32 %v2061_v56, %v655_v57  ;;  %v2063_v2 = vpop.eup %2062 }
 0x22a   : > { %v781_v62 = vadd.f32 %v780_v58, %v779_v60 }
 0x22c   : > { %2064 = vtanh.f32 %v781_v62  ;;  %v2547_v63 = vsel %vm790_vm10, %v781_v62, %v655_v57 }
 0x236   : > { %v2065_v3 = vpop.eup %2064 }
 0x237   : > { %v783_v4 = vmul.f32 %v2065_v3, %v2063_v2 }
 0x239   : > { %v2552_v6 = vsel %vm790_vm10, %v783_v4, %v2493_v48  ;;  %v795_v45 = vsel %vm790_vm10, %v783_v4, 0.0  ;;  %v1890_v48 = vld [vmem:[%s1733_s11 + $0x40] sm:$0xff]  ;;  %v927_v4 = vpop.permute.xlu1 %926  ;;  %s1935_s11 = smul.u32 4294967072, %s2208_s15 }
 0x23a   : > { %v811_v43 = vpack.c.bf16 %v2552_v6, %v2552_v6  ;;  %1888 = vst [vmem:[%s1729_s8 + $0x8] sm:$0xff] %v795_v45  ;;  %vm928_vm11 = vcmp.eq.s32.totalorder %v927_v4, 1  ;;  %s1759_s8 = scalar_lea.vmem %s2471_s9, %s1925_s7 }
 0x23b   : > { %s1767_s12 = scalar_lea.vmem %s2471_s9, %s1935_s11  ;;  %s1943_s9 = smul.u32 4294967240, %s2208_s15 }
 0x23c   : > { %845 = vmatmul.mubr.bf16.vlgmr.msra.gmra.mrb[8].mxu0 %v811_v43  ;;  %886 = vmatmul.mubr.bf16.vlgmr.msra.gmra.mrb[8].mxu1 %v811_v43 }
 0x23d   : > { %950 = vmatpush1.bf16.msra.mxu0 %v2300_v8  ;;  %991 = vmatpush1.bf16.msra.mxu1 %v2320_v14  ;;  %s1771_s14 = scalar_lea.vmem %s2482_s19, %s1943_s9 }
 0x23e   : > { %951 = vmatprep.subr.bf16.mxu0 %v2305_v9  ;;  %992 = vmatprep.subr.bf16.mxu1 %v2335_v18 }
 0x23f   : > { %981 = vmatprep.mubr.bf16.mxu0 %v2218_v1  ;;  %1022 = vmatprep.mubr.bf16.mxu1 %v2218_v1 }
 0x241   : > { %952 = vmatpush1.bf16.msra.mxu0 %v2309_v10  ;;  %993 = vmatpush1.bf16.msra.mxu1 %v2338_v19 }
 0x242   : > { %953 = vmatprep.subr.bf16.mxu0 %v2314_v11  ;;  %994 = vmatprep.subr.bf16.mxu1 %v2350_v23 }
 0x245   : > { %954 = vmatpush1.bf16.msra.mxu0 %v2325_v16  ;;  %995 = vmatpush1.bf16.msra.mxu1 %v2355_v24 }
 0x246   : > { %955 = vmatprep.subr.bf16.mxu0 %v2331_v17  ;;  %996 = vmatprep.subr.bf16.mxu1 %v2359_v25 }
 0x249   : > { %956 = vmatpush1.bf16.msra.mxu0 %v2344_v21  ;;  %997 = vmatpush1.bf16.msra.mxu1 %v2371_v28 }
 0x24a   : > { %957 = vmatprep.subr.bf16.mxu0 %v2347_v22  ;;  %998 = vmatprep.subr.bf16.mxu1 %v2375_v29 }
 0x24d   : > { %958 = vmatpush1.bf16.msra.mxu0 %v2363_v26  ;;  %999 = vmatpush1.bf16.msra.mxu1 %v2387_v32 }
 0x24e   : > { %959 = vmatprep.subr.bf16.mxu0 %v2367_v27  ;;  %1000 = vmatprep.subr.bf16.mxu1 %v2391_v33 }
 0x251   : > { %960 = vmatpush1.bf16.msra.mxu0 %v2379_v30  ;;  %1001 = vmatpush1.bf16.msra.mxu1 %v2403_v36 }
 0x252   : > { %961 = vmatprep.subr.bf16.mxu0 %v2382_v31  ;;  %1002 = vmatprep.subr.bf16.mxu1 %v2407_v37 }
 0x255   : > { %962 = vmatpush1.bf16.msra.mxu0 %v2395_v34  ;;  %1003 = vmatpush1.bf16.msra.mxu1 %v2416_v39 }
 0x256   : > { %963 = vmatprep.subr.bf16.mxu0 %v2399_v35  ;;  %1004 = vmatprep.subr.bf16.mxu1 %v2420_v40 }
 0x259   : > { %964 = vmatpush1.bf16.msra.mxu0 %v2411_v38  ;;  %1005 = vmatpush1.bf16.msra.mxu1 %v2425_v41 }
 0x25a   : > { %1086 = vmatprep.subr.bf16.mxu0 %v2295_v5  ;;  %1127 = vmatprep.subr.bf16.mxu1 %v2317_v13 }
 0x30f   : > { %v846_v12 = vpop.f32.mrb[8].mxu0  ;;  %v887_v15 = vpop.f32.mrb[8].mxu1 }
 0x310   : > { %v894_v0 = vadd.f32 %v1890_v48, %v846_v12  ;;  %v848_v20 = vpop.f32.mrb[9].mxu0  ;;  %v889_v42 = vpop.f32.mrb[9].mxu1  ;;  %v896_v57 = vadd.f32 %v1892_v55, %v887_v15 }
 0x311   : > { %v895_v44 = vadd.f32 %v1891_v7, %v848_v20  ;;  %v850_v46 = vpop.f32.mrb[10].mxu0  ;;  %v891_v47 = vpop.f32.mrb[10].mxu1  ;;  %v897_v54 = vadd.f32 %v1893_v53, %v889_v42 }
 0x312   : > { %v1894_v49 = vmul.f32 -1.442695, %v894_v0  ;;  %v851_v50 = vpop.f32.mrb[11].mxu0  ;;  %v892_v51 = vpop.f32.mrb[11].mxu1 }
 0x313   : > { %v1895_v52 = vmul.f32 -1.442695, %v895_v44  ;;  %v1896_v56 = vmul.f32 -1.442695, %v897_v54 }
 0x314   : > { %2066 = vpow2.f32 %v1894_v49 }
 0x315   : > { %2068 = vpow2.f32 %v1895_v52 }
 0x316   : > { %2070 = vpow2.f32 %v1896_v56 }
 0x317   : > { %2072 = vtanh.f32 %v896_v57 }
 0x31e   : > { %v2067_v58 = vpop.eup %2066 }
 0x31f   : > { %v2069_v59 = vpop.eup %2068  ;;  %v901_v60 = vadd.f32 1.0, %v2067_v58 }
 0x320   : > { %v907_v61 = vadd.f32 1.0, %v2069_v59  ;;  %v2071_v62 = vpop.eup %2070 }
 0x321   : > { %2074 = vrcp.f32 %v901_v60  ;;  %v2073_v2 = vpop.eup %2072  ;;  %v914_v43 = vadd.f32 1.0, %v2071_v62  ;;  %v1902_v62 = vld [vmem:[%s1740_s20 + $0x70] sm:$0xff] }
 0x322   : > { %2076 = vrcp.f32 %v907_v61 }
 0x323   : > { %2078 = vrcp.f32 %v914_v43 }
 0x32b   : > { %v2075_v3 = vpop.eup %2074 }
 0x32c   : > { %v2077_v45 = vpop.eup %2076  ;;  %v918_v48 = vmul.f32 %v2075_v3, %v2073_v2 }
 0x32d   : > { %v917_v7 = vmul.f32 %v2077_v45, %v2547_v63  ;;  %v2079_v0 = vpop.eup %2078 }
 0x32f   : > { %v919_v12 = vadd.f32 %v918_v48, %v917_v7 }
 0x331   : > { %2080 = vtanh.f32 %v919_v12  ;;  %v2594_v15 = vsel %vm928_vm11, %v919_v12, %v2547_v63  ;;  %v1900_v63 = vld [vmem:[%s1740_s20 + $0x60] sm:$0xff] }
 0x33b   : > { %v2081_v20 = vpop.eup %2080 }
 0x33c   : > { %v921_v42 = vmul.f32 %v2081_v20, %v2079_v0 }
 0x33e   : > { %v2599_v44 = vsel %vm928_vm11, %v921_v42, %v2552_v6  ;;  %v933_v46 = vsel %vm928_vm11, %v921_v42, 0.0  ;;  %v1901_v6 = vld [vmem:[%s1740_s20 + $0x68] sm:$0xff] }
 0x33f   : > { %1898 = vst [vmem:[%s1737_s13 + $0x10] sm:$0xff] %v933_v46  ;;  %v948_v47 = vpack.c.bf16 %v2599_v44, %v2599_v44  ;;  %s1840_s13 = sshll.u32 %s2276_s23, 3 }
 0x341   : > { %982 = vmatmul.mubr.bf16.vlgmr.msra.gmra.mrb[12].mxu0 %v948_v47  ;;  %1023 = vmatmul.mubr.bf16.vlgmr.msra.gmra.mrb[12].mxu1 %v948_v47 }
 0x342   : > { %1087 = vmatpush1.bf16.msra.mxu0 %v2300_v8  ;;  %1128 = vmatpush1.bf16.msra.mxu1 %v2320_v14 }
 0x343   : > { %1088 = vmatprep.subr.bf16.mxu0 %v2305_v9  ;;  %1129 = vmatprep.subr.bf16.mxu1 %v2335_v18 }
 0x344   : > { %1118 = vmatprep.mubr.bf16.mxu0 %v2218_v1  ;;  %1159 = vmatprep.mubr.bf16.mxu1 %v2218_v1 }
 0x346   : > { %1089 = vmatpush1.bf16.msra.mxu0 %v2309_v10  ;;  %1130 = vmatpush1.bf16.msra.mxu1 %v2338_v19 }
 0x347   : > { %1090 = vmatprep.subr.bf16.mxu0 %v2314_v11  ;;  %1131 = vmatprep.subr.bf16.mxu1 %v2350_v23 }
 0x34a   : > { %1091 = vmatpush1.bf16.msra.mxu0 %v2325_v16  ;;  %1132 = vmatpush1.bf16.msra.mxu1 %v2355_v24 }
 0x34b   : > { %1092 = vmatprep.subr.bf16.mxu0 %v2331_v17  ;;  %1133 = vmatprep.subr.bf16.mxu1 %v2359_v25 }
 0x34e   : > { %1093 = vmatpush1.bf16.msra.mxu0 %v2344_v21  ;;  %1134 = vmatpush1.bf16.msra.mxu1 %v2371_v28 }
 0x34f   : > { %1094 = vmatprep.subr.bf16.mxu0 %v2347_v22  ;;  %1135 = vmatprep.subr.bf16.mxu1 %v2375_v29 }
 0x352   : > { %1095 = vmatpush1.bf16.msra.mxu0 %v2363_v26  ;;  %1136 = vmatpush1.bf16.msra.mxu1 %v2387_v32 }
 0x353   : > { %1096 = vmatprep.subr.bf16.mxu0 %v2367_v27  ;;  %1137 = vmatprep.subr.bf16.mxu1 %v2391_v33 }
 0x356   : > { %1097 = vmatpush1.bf16.msra.mxu0 %v2379_v30  ;;  %1138 = vmatpush1.bf16.msra.mxu1 %v2403_v36 }
 0x357   : > { %1098 = vmatprep.subr.bf16.mxu0 %v2382_v31  ;;  %1139 = vmatprep.subr.bf16.mxu1 %v2407_v37 }
 0x35a   : > { %1099 = vmatpush1.bf16.msra.mxu0 %v2395_v34  ;;  %1140 = vmatpush1.bf16.msra.mxu1 %v2416_v39 }
 0x35b   : > { %1100 = vmatprep.subr.bf16.mxu0 %v2399_v35  ;;  %1141 = vmatprep.subr.bf16.mxu1 %v2420_v40 }
 0x35e   : > { %1101 = vmatpush1.bf16.msra.mxu0 %v2411_v38  ;;  %1142 = vmatpush1.bf16.msra.mxu1 %v2425_v41 }
 0x35f   : > { %1224 = vmatprep.subr.bf16.mxu0 %v2295_v5  ;;  %1265 = vmatprep.subr.bf16.mxu1 %v2317_v13  ;;  %v1903_v5 = vld [vmem:[%s1740_s20 + $0x78] sm:$0xff] }
 0x414   : > { %v983_v49 = vpop.f32.mrb[12].mxu0  ;;  %v1024_v50 = vpop.f32.mrb[12].mxu1 }
 0x415   : > { %v1031_v51 = vadd.f32 %v1900_v63, %v983_v49  ;;  %v985_v52 = vpop.f32.mrb[13].mxu0  ;;  %v1026_v53 = vpop.f32.mrb[13].mxu1  ;;  %v1033_v3 = vadd.f32 %v1902_v62, %v1024_v50 }
 0x416   : > { %v1032_v54 = vadd.f32 %v1901_v6, %v985_v52  ;;  %v987_v55 = vpop.f32.mrb[14].mxu0  ;;  %v1028_v56 = vpop.f32.mrb[14].mxu1  ;;  %v1034_v61 = vadd.f32 %v1903_v5, %v1026_v53 }
 0x417   : > { %v1904_v57 = vmul.f32 -1.442695, %v1031_v51  ;;  %v988_v58 = vpop.f32.mrb[15].mxu0  ;;  %v1029_v59 = vpop.f32.mrb[15].mxu1 }
 0x418   : > { %v1905_v60 = vmul.f32 -1.442695, %v1032_v54  ;;  %v1906_v2 = vmul.f32 -1.442695, %v1034_v61  ;;  %v1064_v63 = vpop.permute.xlu1 %1063 }
 0x419   : > { %2082 = vpow2.f32 %v1904_v57  ;;  %vm1065_vm12 = vcmp.eq.s32.totalorder %v1064_v63, 1  ;;  %v1201_v57 = vpop.permute.xlu0 %1200  ;;  %v2747_v63 = vld [vmem:[%s2291_s29 + $0x6c] ss:$16 sps:$4 sm:$0xff]  }
 0x41a   : > { %2084 = vpow2.f32 %v1905_v60  ;;  %vm1202_vm13 = vcmp.eq.s32.totalorder %v1201_v57, 1 }
 0x41b   : > { %2086 = vpow2.f32 %v1906_v2 }
 0x41c   : > { %2088 = vtanh.f32 %v1033_v3 }
 0x423   : > { %v2083_v4 = vpop.eup %2082 }
 0x424   : > { %v2085_v45 = vpop.eup %2084  ;;  %v1038_v43 = vadd.f32 1.0, %v2083_v4  ;;  %v2701_v4 = vld [vmem:[%s2291_s29] ss:$16 sps:$4 sm:$0xff]  }
 0x425   : > { %v1044_v48 = vadd.f32 1.0, %v2085_v45  ;;  %v2087_v7 = vpop.eup %2086  ;;  %v2705_v45 = vld [vmem:[%s2291_s29 + $0x8] ss:$16 sps:$4 sm:$0xff]  }
 0x426   : > { %2090 = vrcp.f32 %v1038_v43  ;;  %v2089_v12 = vpop.eup %2088  ;;  %v1051_v46 = vadd.f32 1.0, %v2087_v7  ;;  %v2709_v43 = vld [vmem:[%s2291_s29 + $0x24] ss:$16 sps:$4 sm:$0xff]   ;;  %v2719_v7 = vld [vmem:[%s2291_s29 + $0x20] ss:$16 sps:$4 sm:$0xff]  }
 0x427   : > { %2092 = vrcp.f32 %v1044_v48  ;;  %v2713_v48 = vld [vmem:[%s2291_s29 + $0x2c] ss:$16 sps:$4 sm:$0xff]  }
 0x428   : > { %2094 = vrcp.f32 %v1051_v46  ;;  %v2739_v46 = vld [vmem:[%s2291_s29 + $0x48] ss:$16 sps:$4 sm:$0xff]  }
 0x430   : > { %v2091_v0 = vpop.eup %2090 }
 0x431   : > { %v2093_v20 = vpop.eup %2092  ;;  %v1055_v42 = vmul.f32 %v2091_v0, %v2089_v12  ;;  %v2723_v12 = vld [vmem:[%s2291_s29 + $0x28] ss:$16 sps:$4 sm:$0xff]   ;;  %v2727_v0 = vld [vmem:[%s2291_s29 + $0x44] ss:$16 sps:$4 sm:$0xff]  }
 0x432   : > { %v1054_v47 = vmul.f32 %v2093_v20, %v2594_v15  ;;  %v2095_v50 = vpop.eup %2094  ;;  %v2731_v20 = vld [vmem:[%s2291_s29 + $0x4c] ss:$16 sps:$4 sm:$0xff]  }
 0x434   : > { %v1056_v6 = vadd.f32 %v1055_v42, %v1054_v47  ;;  %v2735_v42 = vld [vmem:[%s2291_s29 + $0x40] ss:$16 sps:$4 sm:$0xff]   ;;  %v2743_v47 = vld [vmem:[%s2291_s29 + $0x64] ss:$16 sps:$4 sm:$0xff]  }
 0x436   : > { %2096 = vtanh.f32 %v1056_v6  ;;  %v2641_v49 = vsel %vm1065_vm12, %v1056_v6, %v2594_v15  ;;  %v2751_v6 = vld [vmem:[%s2291_s29 + $0x60] ss:$16 sps:$4 sm:$0xff]  }
 0x440   : > { %v2097_v51 = vpop.eup %2096 }
 0x441   : > { %v1058_v52 = vmul.f32 %v2097_v51, %v2095_v50  ;;  %v2759_v50 = vld [vmem:[%s2291_s29 + $0x84] ss:$16 sps:$4 sm:$0xff]   ;;  %v2763_v51 = vld [vmem:[%s2291_s29 + $0x8c] ss:$16 sps:$4 sm:$0xff]  }
 0x443   : > { %v2646_v53 = vsel %vm1065_vm12, %v1058_v52, %v2599_v44  ;;  %v1070_v54 = vsel %vm1065_vm12, %v1058_v52, 0.0  ;;  %v2767_v52 = vld [vmem:[%s2291_s29 + $0x80] ss:$16 sps:$4 sm:$0xff]  }
 0x444   : > { %1908 = vst [vmem:[%s1743_s22 + $0x18] sm:$0xff] %v1070_v54  ;;  %v1085_v55 = vpack.c.bf16 %v2646_v53, %v2646_v53  ;;  %v2775_v54 = vld [vmem:[%s2291_s29 + $0xa4] ss:$16 sps:$4 sm:$0xff]   ;;  %s318_s22 = scalar_lea.vmem %s2888_s4, %s1840_s13 }
 0x446   : > { %1119 = vmatmul.mubr.bf16.vlgmr.msra.gmra.mrb[16].mxu0 %v1085_v55  ;;  %1160 = vmatmul.mubr.bf16.vlgmr.msra.gmra.mrb[16].mxu1 %v1085_v55  ;;  %v2779_v55 = vld [vmem:[%s2291_s29 + $0xac] ss:$16 sps:$4 sm:$0xff]  }
 0x447   : > { %1225 = vmatpush1.bf16.msra.mxu0 %v2300_v8  ;;  %1266 = vmatpush1.bf16.msra.mxu1 %v2320_v14  ;;  %v2683_v8 = vld [vmem:[%s2291_s29 + $0x4] ss:$16 sps:$4 sm:$0xff]  }
 0x448   : > { %1226 = vmatprep.subr.bf16.mxu0 %v2305_v9  ;;  %1267 = vmatprep.subr.bf16.mxu1 %v2335_v18  ;;  %v1081_v9 = vld [vmem:[%s1080_s26] sm:$0xff] }
 0x449   : > { %1256 = vmatprep.mubr.bf16.mxu0 %v2218_v1  ;;  %1297 = vmatprep.mubr.bf16.mxu1 %v2218_v1 }
 0x44b   : > { %1227 = vmatpush1.bf16.msra.mxu0 %v2309_v10  ;;  %1268 = vmatpush1.bf16.msra.mxu1 %v2338_v19  ;;  %v1082_v10 = vld [vmem:[%s1080_s26 + $0x8] sm:$0xff] }
 0x44c   : > { %1228 = vmatprep.subr.bf16.mxu0 %v2314_v11  ;;  %1269 = vmatprep.subr.bf16.mxu1 %v2350_v23 }
 0x44f   : > { %1229 = vmatpush1.bf16.msra.mxu0 %v2325_v16  ;;  %1270 = vmatpush1.bf16.msra.mxu1 %v2355_v24 }
 0x450   : > { %1230 = vmatprep.subr.bf16.mxu0 %v2331_v17  ;;  %1271 = vmatprep.subr.bf16.mxu1 %v2359_v25 }
 0x453   : > { %1231 = vmatpush1.bf16.msra.mxu0 %v2344_v21  ;;  %1272 = vmatpush1.bf16.msra.mxu1 %v2371_v28  ;;  %v1083_v28 = vld [vmem:[%s1080_s26 + $0x10] sm:$0xff] }
 0x454   : > { %1232 = vmatprep.subr.bf16.mxu0 %v2347_v22  ;;  %1273 = vmatprep.subr.bf16.mxu1 %v2375_v29 }
 0x457   : > { %1233 = vmatpush1.bf16.msra.mxu0 %v2363_v26  ;;  %1274 = vmatpush1.bf16.msra.mxu1 %v2387_v32 }
 0x458   : > { %1234 = vmatprep.subr.bf16.mxu0 %v2367_v27  ;;  %1275 = vmatprep.subr.bf16.mxu1 %v2391_v33  ;;  %v1084_v27 = vld [vmem:[%s1080_s26 + $0x18] sm:$0xff] }
 0x45b   : > { %1235 = vmatpush1.bf16.msra.mxu0 %v2379_v30  ;;  %1276 = vmatpush1.bf16.msra.mxu1 %v2403_v36 }
 0x45c   : > { %1236 = vmatprep.subr.bf16.mxu0 %v2382_v31  ;;  %1277 = vmatprep.subr.bf16.mxu1 %v2407_v37 }
 0x45f   : > { %1237 = vmatpush1.bf16.msra.mxu0 %v2395_v34  ;;  %1278 = vmatpush1.bf16.msra.mxu1 %v2416_v39 }
 0x460   : > { %1238 = vmatprep.subr.bf16.mxu0 %v2399_v35  ;;  %1279 = vmatprep.subr.bf16.mxu1 %v2420_v40 }
 0x463   : > { %1239 = vmatpush1.bf16.msra.mxu0 %v2411_v38  ;;  %1280 = vmatpush1.bf16.msra.mxu1 %v2425_v41 }
 0x464   : > { %1362 = vmatprep.subr.bf16.mxu0 %v2683_v8  ;;  %1403 = vmatprep.subr.bf16.mxu1 %v2317_v13 }
 0x519   : > { %v1120_v11 = vpop.f32.mrb[16].mxu0  ;;  %v1161_v14 = vpop.f32.mrb[16].mxu1 }
 0x51a   : > { %v1168_v16 = vadd.f32 %v1120_v11, %v1081_v9  ;;  %v1122_v17 = vpop.f32.mrb[17].mxu0  ;;  %v1163_v18 = vpop.f32.mrb[17].mxu1  ;;  %v1170_v30 = vadd.f32 %v1161_v14, %v1083_v28  ;;  %v2783_v9 = vld [vmem:[%s2291_s29 + $0xa0] ss:$16 sps:$4 sm:$0xff]   ;;  %v2791_v11 = vld [vmem:[%s2291_s29 + $0xc4] ss:$16 sps:$4 sm:$0xff]  }
 0x51b   : > { %v1169_v19 = vadd.f32 %v1122_v17, %v1082_v10  ;;  %v1124_v21 = vpop.f32.mrb[18].mxu0  ;;  %v1165_v22 = vpop.f32.mrb[18].mxu1  ;;  %v1171_v13 = vadd.f32 %v1163_v18, %v1084_v27  ;;  %v2787_v10 = vld [vmem:[%s2291_s29 + $0xa8] ss:$16 sps:$4 sm:$0xff]   ;;  %v2795_v14 = vld [vmem:[%s2291_s29 + $0xcc] ss:$16 sps:$4 sm:$0xff]  }
 0x51c   : > { %v1911_v23 = vmul.f32 -1.442695, %v1168_v16  ;;  %v1125_v24 = vpop.f32.mrb[19].mxu0  ;;  %v1166_v25 = vpop.f32.mrb[19].mxu1  ;;  %v2799_v16 = vld [vmem:[%s2291_s29 + $0xc0] ss:$16 sps:$4 sm:$0xff]  }
 0x51d   : > { %v1912_v26 = vmul.f32 -1.442695, %v1169_v19  ;;  %v1913_v29 = vmul.f32 -1.442695, %v1171_v13  ;;  %v2804_v17 = vld [vmem:[%s2291_s29 + $0xe4] ss:$16 sps:$4 sm:$0xff]  }
 0x51e   : > { %2098 = vpow2.f32 %v1911_v23  ;;  %v2809_v18 = vld [vmem:[%s2291_s29 + $0xe0] ss:$16 sps:$4 sm:$0xff]   ;;  %v2190_v19 = vld [vmem:[%s2291_s29 + $0xc] ss:$16 sps:$4 sm:$0xff]  }
 0x51f   : > { %2100 = vpow2.f32 %v1912_v26  ;;  %v1916_v21 = vld [vmem:[%s1751_s30 + $0xa0] sm:$0xff] }
 0x520   : > { %2102 = vpow2.f32 %v1913_v29 }
 0x521   : > { %2104 = vtanh.f32 %v1170_v30 }
 0x528   : > { %v2099_v31 = vpop.eup %2098 }
 0x529   : > { %v2101_v32 = vpop.eup %2100  ;;  %v1175_v33 = vadd.f32 1.0, %v2099_v31 }
 0x52a   : > { %v1181_v34 = vadd.f32 1.0, %v2101_v32  ;;  %v2103_v35 = vpop.eup %2102  ;;  %v1918_v32 = vld [vmem:[%s1751_s30 + $0xb0] sm:$0xff] }
 0x52b   : > { %2106 = vrcp.f32 %v1175_v33  ;;  %v2105_v36 = vpop.eup %2104  ;;  %v1188_v44 = vadd.f32 1.0, %v2103_v35 }
 0x52c   : > { %2108 = vrcp.f32 %v1181_v34 }
 0x52d   : > { %2110 = vrcp.f32 %v1188_v44 }
 0x535   : > { %v2107_v37 = vpop.eup %2106 }
 0x536   : > { %v2109_v38 = vpop.eup %2108  ;;  %v1192_v15 = vmul.f32 %v2107_v37, %v2105_v36 }
 0x537   : > { %v1191_v56 = vmul.f32 %v2109_v38, %v2641_v49  ;;  %v2111_v60 = vpop.eup %2110 }
 0x539   : > { %v1193_v58 = vadd.f32 %v1192_v15, %v1191_v56 }
 0x53b   : > { %2112 = vtanh.f32 %v1193_v58  ;;  %v2691_v59 = vsel %vm1202_vm13, %v1193_v58, %v2641_v49  ;;  %v2755_v49 = vld [vmem:[%s2291_s29 + $0x68] ss:$16 sps:$4 sm:$0xff]  }
 0x545   : > { %v2113_v5 = vpop.eup %2112 }
 0x546   : > { %v1195_v61 = vmul.f32 %v2113_v5, %v2111_v60 }
 0x548   : > { %v2696_v62 = vsel %vm1202_vm13, %v1195_v61, %v2646_v53  ;;  %v1207_v2 = vsel %vm1202_vm13, %v1195_v61, 0.0  ;;  %v2771_v53 = vld [vmem:[%s2291_s29 + $0x88] ss:$16 sps:$4 sm:$0xff]   ;;  %v1339_v61 = vpop.permute.xlu1 %1338 }
 0x549   : > { %1210 = vst [vmem:[%s1209_s28] sm:$0xff] %v1207_v2  ;;  %v1223_v3 = vpack.c.bf16 %v2696_v62, %v2696_v62  ;;  %vm1340_vm14 = vcmp.eq.s32.totalorder %v1339_v61, 1 }
 0x54b   : > { %1257 = vmatmul.mubr.bf16.vlgmr.msra.gmra.mrb[20].mxu0 %v1223_v3  ;;  %1298 = vmatmul.mubr.bf16.vlgmr.msra.gmra.mrb[20].mxu1 %v1223_v3 }
 0x54c   : > { %1363 = vmatpush1.bf16.msra.mxu0 %v2701_v4  ;;  %1404 = vmatpush1.bf16.msra.mxu1 %v2705_v45 }
 0x54d   : > { %1364 = vmatprep.subr.bf16.mxu0 %v2709_v43  ;;  %1405 = vmatprep.subr.bf16.mxu1 %v2713_v48 }
 0x54e   : > { %1394 = vmatprep.mubr.bf16.mxu0 %v2218_v1  ;;  %1435 = vmatprep.mubr.bf16.mxu1 %v2218_v1 }
 0x550   : > { %1365 = vmatpush1.bf16.msra.mxu0 %v2719_v7  ;;  %1406 = vmatpush1.bf16.msra.mxu1 %v2723_v12 }
 0x551   : > { %1366 = vmatprep.subr.bf16.mxu0 %v2727_v0  ;;  %1407 = vmatprep.subr.bf16.mxu1 %v2731_v20 }
 0x554   : > { %1367 = vmatpush1.bf16.msra.mxu0 %v2735_v42  ;;  %1408 = vmatpush1.bf16.msra.mxu1 %v2739_v46 }
 0x555   : > { %1368 = vmatprep.subr.bf16.mxu0 %v2743_v47  ;;  %1409 = vmatprep.subr.bf16.mxu1 %v2747_v63 }
 0x558   : > { %1369 = vmatpush1.bf16.msra.mxu0 %v2751_v6  ;;  %1410 = vmatpush1.bf16.msra.mxu1 %v2755_v49 }
 0x559   : > { %1370 = vmatprep.subr.bf16.mxu0 %v2759_v50  ;;  %1411 = vmatprep.subr.bf16.mxu1 %v2763_v51 }
 0x55c   : > { %1371 = vmatpush1.bf16.msra.mxu0 %v2767_v52  ;;  %1412 = vmatpush1.bf16.msra.mxu1 %v2771_v53 }
 0x55d   : > { %1372 = vmatprep.subr.bf16.mxu0 %v2775_v54  ;;  %1413 = vmatprep.subr.bf16.mxu1 %v2779_v55 }
 0x560   : > { %1373 = vmatpush1.bf16.msra.mxu0 %v2783_v9  ;;  %1414 = vmatpush1.bf16.msra.mxu1 %v2787_v10 }
 0x561   : > { %1374 = vmatprep.subr.bf16.mxu0 %v2791_v11  ;;  %1415 = vmatprep.subr.bf16.mxu1 %v2795_v14 }
 0x564   : > { %1375 = vmatpush1.bf16.msra.mxu0 %v2799_v16  ;;  %1416 = vmatpush1.bf16.msra.mxu1 %v2416_v39  ;;  %v1917_v39 = vld [vmem:[%s1751_s30 + $0xa8] sm:$0xff] }
 0x565   : > { %1376 = vmatprep.subr.bf16.mxu0 %v2804_v17  ;;  %1417 = vmatprep.subr.bf16.mxu1 %v2420_v40 }
 0x568   : > { %1377 = vmatpush1.bf16.msra.mxu0 %v2809_v18  ;;  %1418 = vmatpush1.bf16.msra.mxu1 %v2425_v41 }
 0x569   : > { %1500 = vmatprep.subr.bf16.mxu0 %v2683_v8  ;;  %1541 = vmatprep.subr.bf16.mxu1 %v2190_v19  ;;  %v1919_v8 = vld [vmem:[%s1751_s30 + $0xb8] sm:$0xff] }
 0x61e   : > { %v1258_v22 = vpop.f32.mrb[20].mxu0  ;;  %v1299_v23 = vpop.f32.mrb[20].mxu1 }
 0x61f   : > { %v1306_v24 = vadd.f32 %v1916_v21, %v1258_v22  ;;  %v1260_v25 = vpop.f32.mrb[21].mxu0  ;;  %v1301_v26 = vpop.f32.mrb[21].mxu1  ;;  %v1308_v34 = vadd.f32 %v1918_v32, %v1299_v23 }
 0x620   : > { %v1307_v40 = vadd.f32 %v1917_v39, %v1260_v25  ;;  %v1262_v27 = vpop.f32.mrb[22].mxu0  ;;  %v1303_v13 = vpop.f32.mrb[22].mxu1  ;;  %v1309_v31 = vadd.f32 %v1919_v8, %v1301_v26 }
 0x621   : > { %v1920_v28 = vmul.f32 -1.442695, %v1306_v24  ;;  %v1263_v29 = vpop.f32.mrb[23].mxu0  ;;  %v1304_v30 = vpop.f32.mrb[23].mxu1 }
 0x622   : > { %v1921_v41 = vmul.f32 -1.442695, %v1307_v40  ;;  %v1922_v33 = vmul.f32 -1.442695, %v1309_v31  ;;  %v1477_v40 = vpop.permute.xlu0 %1476 }
 0x623   : > { %2114 = vpow2.f32 %v1920_v28  ;;  %vm1478_vm15 = vcmp.eq.s32.totalorder %v1477_v40, 1 }
 0x624   : > { %2116 = vpow2.f32 %v1921_v41 }
 0x625   : > { %2118 = vpow2.f32 %v1922_v33  ;;  %v1936_v33 = vld [vmem:[%s1767_s12 + $0xe0] sm:$0xff] }
 0x626   : > { %2120 = vtanh.f32 %v1308_v34  ;;  %v1937_v34 = vld [vmem:[%s1767_s12 + $0xe8] sm:$0xff] }
 0x62d   : > { %v2115_v35 = vpop.eup %2114 }
 0x62e   : > { %v2117_v36 = vpop.eup %2116  ;;  %v1313_v37 = vadd.f32 1.0, %v2115_v35 }
 0x62f   : > { %v1319_v38 = vadd.f32 1.0, %v2117_v36  ;;  %v2119_v15 = vpop.eup %2118 }
 0x630   : > { %2122 = vrcp.f32 %v1313_v37  ;;  %v2121_v44 = vpop.eup %2120  ;;  %v1326_v60 = vadd.f32 1.0, %v2119_v15 }
 0x631   : > { %2124 = vrcp.f32 %v1319_v38 }
 0x632   : > { %2126 = vrcp.f32 %v1326_v60 }
 0x63a   : > { %v2123_v56 = vpop.eup %2122 }
 0x63b   : > { %v2125_v57 = vpop.eup %2124  ;;  %v1330_v58 = vmul.f32 %v2123_v56, %v2121_v44 }
 0x63c   : > { %v1329_v5 = vmul.f32 %v2125_v57, %v2691_v59  ;;  %v2127_v19 = vpop.eup %2126 }
 0x63e   : > { %v1331_v2 = vadd.f32 %v1330_v58, %v1329_v5 }
 0x640   : > { %2128 = vtanh.f32 %v1331_v2  ;;  %v2819_v3 = vsel %vm1340_vm14, %v1331_v2, %v2691_v59  ;;  %v2192_v59 = vld [vmem:[%s2291_s29 + $0xec] ss:$16 sps:$4 sm:$0xff]  }
 0x641   : > { %v1939_v2 = vld [vmem:[%s1767_s12 + $0xf8] sm:$0xff] }
 0x64a   : > { %v2129_v21 = vpop.eup %2128 }
 0x64b   : > { %v1333_v39 = vmul.f32 %v2129_v21, %v2127_v19  ;;  %v1938_v19 = vld [vmem:[%s1767_s12 + $0xf0] sm:$0xff] }
 0x64d   : > { %v2824_v22 = vsel %vm1340_vm14, %v1333_v39, %v2696_v62  ;;  %v1345_v23 = vsel %vm1340_vm14, %v1333_v39, 0.0  ;;  %v2193_v62 = vld [vmem:[%s2291_s29 + $0xe8] ss:$16 sps:$4 sm:$0xff]  }
 0x64e   : > { %1924 = vst [vmem:[%s1755_s6 + $0x28] sm:$0xff] %v1345_v23  ;;  %v1361_v24 = vpack.c.bf16 %v2824_v22, %v2824_v22 }
 0x650   : > { %1395 = vmatmul.mubr.bf16.vlgmr.msra.gmra.mrb[24].mxu0 %v1361_v24  ;;  %1436 = vmatmul.mubr.bf16.vlgmr.msra.gmra.mrb[24].mxu1 %v1361_v24 }
 0x651   : > { %1501 = vmatpush1.bf16.msra.mxu0 %v2701_v4  ;;  %1542 = vmatpush1.bf16.msra.mxu1 %v2705_v45  ;;  %v1926_v4 = vld [vmem:[%s1759_s8 + $0xc0] sm:$0xff]  ;;  %v1927_v45 = vld [vmem:[%s1759_s8 + $0xc8] sm:$0xff] }
 0x652   : > { %1502 = vmatprep.subr.bf16.mxu0 %v2709_v43  ;;  %1543 = vmatprep.subr.bf16.mxu1 %v2713_v48 }
 0x653   : > { %1532 = vmatprep.mubr.bf16.mxu0 %v2218_v1  ;;  %1573 = vmatprep.mubr.bf16.mxu1 %v2218_v1  ;;  %v2191_v1 = vld [vmem:[%s2291_s29 + $0xc8] ss:$16 sps:$4 sm:$0xff]   ;;  %s1933_s29 = smul.u32 4294967256, %s2208_s15 }
 0x655   : > { %1503 = vmatpush1.bf16.msra.mxu0 %v2719_v7  ;;  %1544 = vmatpush1.bf16.msra.mxu1 %v2723_v12  ;;  %s1763_s10 = scalar_lea.vmem %s2482_s19, %s1933_s29 }
 0x656   : > { %1504 = vmatprep.subr.bf16.mxu0 %v2727_v0  ;;  %1545 = vmatprep.subr.bf16.mxu1 %v2731_v20 }
 0x659   : > { %1505 = vmatpush1.bf16.msra.mxu0 %v2735_v42  ;;  %1546 = vmatpush1.bf16.msra.mxu1 %v2739_v46 }
 0x65a   : > { %1506 = vmatprep.subr.bf16.mxu0 %v2743_v47  ;;  %1547 = vmatprep.subr.bf16.mxu1 %v2747_v63 }
 0x65d   : > { %1507 = vmatpush1.bf16.msra.mxu0 %v2751_v6  ;;  %1548 = vmatpush1.bf16.msra.mxu1 %v2755_v49 }
 0x65e   : > { %1508 = vmatprep.subr.bf16.mxu0 %v2759_v50  ;;  %1549 = vmatprep.subr.bf16.mxu1 %v2763_v51  ;;  %v1929_v50 = vld [vmem:[%s1759_s8 + $0xd8] sm:$0xff] }
 0x661   : > { %1509 = vmatpush1.bf16.msra.mxu0 %v2767_v52  ;;  %1550 = vmatpush1.bf16.msra.mxu1 %v2771_v53  ;;  %v1928_v52 = vld [vmem:[%s1759_s8 + $0xd0] sm:$0xff] }
 0x662   : > { %1510 = vmatprep.subr.bf16.mxu0 %v2775_v54  ;;  %1551 = vmatprep.subr.bf16.mxu1 %v2779_v55 }
 0x665   : > { %1511 = vmatpush1.bf16.msra.mxu0 %v2783_v9  ;;  %1552 = vmatpush1.bf16.msra.mxu1 %v2787_v10 }
 0x666   : > { %1512 = vmatprep.subr.bf16.mxu0 %v2791_v11  ;;  %1553 = vmatprep.subr.bf16.mxu1 %v2795_v14 }
 0x669   : > { %1513 = vmatpush1.bf16.msra.mxu0 %v2799_v16  ;;  %1554 = vmatpush1.bf16.msra.mxu1 %v2191_v1 }
 0x66a   : > { %1514 = vmatprep.subr.bf16.mxu0 %v2804_v17  ;;  %1555 = vmatprep.subr.bf16.mxu1 %v2192_v59 }
 0x66d   : > { %1515 = vmatpush1.bf16.msra.mxu0 %v2809_v18  ;;  %1556 = vmatpush1.bf16.msra.mxu1 %v2193_v62 }
 0x723   : > { %v1396_v43 = vpop.f32.mrb[24].mxu0  ;;  %v1437_v48 = vpop.f32.mrb[24].mxu1 }
 0x724   : > { %v1444_v7 = vadd.f32 %v1926_v4, %v1396_v43  ;;  %v1398_v12 = vpop.f32.mrb[25].mxu0  ;;  %v1439_v0 = vpop.f32.mrb[25].mxu1  ;;  %v1446_v54 = vadd.f32 %v1928_v52, %v1437_v48 }
 0x725   : > { %v1445_v20 = vadd.f32 %v1927_v45, %v1398_v12  ;;  %v1400_v42 = vpop.f32.mrb[26].mxu0  ;;  %v1441_v46 = vpop.f32.mrb[26].mxu1  ;;  %v1447_v51 = vadd.f32 %v1929_v50, %v1439_v0 }
 0x726   : > { %v1930_v47 = vmul.f32 -1.442695, %v1444_v7  ;;  %v1401_v63 = vpop.f32.mrb[27].mxu0  ;;  %v1442_v6 = vpop.f32.mrb[27].mxu1 }
 0x727   : > { %v1931_v49 = vmul.f32 -1.442695, %v1445_v20  ;;  %v1932_v53 = vmul.f32 -1.442695, %v1447_v51  ;;  %v1615_v20 = vpop.permute.xlu1 %1614 }
 0x728   : > { %2130 = vpow2.f32 %v1930_v47  ;;  %vm1616_vm0 = vcmp.eq.s32.totalorder %v1615_v20, 1 }
 0x729   : > { %2132 = vpow2.f32 %v1931_v49 }
 0x72a   : > { %2134 = vpow2.f32 %v1932_v53 }
 0x72b   : > { %2136 = vtanh.f32 %v1446_v54 }
 0x732   : > { %v2131_v55 = vpop.eup %2130 }
 0x733   : > { %v2133_v9 = vpop.eup %2132  ;;  %v1451_v10 = vadd.f32 1.0, %v2131_v55 }
 0x734   : > { %v1457_v11 = vadd.f32 1.0, %v2133_v9  ;;  %v2135_v14 = vpop.eup %2134 }
 0x735   : > { %2138 = vrcp.f32 %v1451_v10  ;;  %v2137_v16 = vpop.eup %2136  ;;  %v1464_v26 = vadd.f32 1.0, %v2135_v14 }
 0x736   : > { %2140 = vrcp.f32 %v1457_v11 }
 0x737   : > { %2142 = vrcp.f32 %v1464_v26 }
 0x73f   : > { %v2139_v17 = vpop.eup %2138 }
 0x740   : > { %v2141_v18 = vpop.eup %2140  ;;  %v1468_v25 = vmul.f32 %v2139_v17, %v2137_v16 }
 0x741   : > { %v1467_v27 = vmul.f32 %v2141_v18, %v2819_v3  ;;  %v2143_v29 = vpop.eup %2142 }
 0x743   : > { %v1469_v13 = vadd.f32 %v1468_v25, %v1467_v27 }
 0x745   : > { %2144 = vtanh.f32 %v1469_v13  ;;  %v1481_v28 = vsel %vm1478_vm15, %v1469_v13, %v2819_v3 }
 0x74f   : > { %v2145_v30 = vpop.eup %2144 }
 0x750   : > { %v1471_v41 = vmul.f32 %v2145_v30, %v2143_v29 }
 0x752   : > { %v1479_v8 = vsel %vm1478_vm15, %v1471_v41, %v2824_v22  ;;  %v1483_v31 = vsel %vm1478_vm15, %v1471_v41, 0.0 }
 0x753   : > { %1934 = vst [vmem:[%s1763_s10 + $0x30] sm:$0xff] %v1483_v31  ;;  %v1499_v32 = vpack.c.bf16 %v1479_v8, %v1479_v8 }
 0x755   : > { %1533 = vmatmul.mubr.bf16.vlgmr.msra.gmra.mrb[28].mxu0 %v1499_v32  ;;  %1574 = vmatmul.mubr.bf16.vlgmr.msra.gmra.mrb[28].mxu1 %v1499_v32 }
 0x828   : > { %v1534_v35 = vpop.f32.mrb[28].mxu0  ;;  %v1575_v36 = vpop.f32.mrb[28].mxu1 }
 0x829   : > { %v1582_v37 = vadd.f32 %v1936_v33, %v1534_v35  ;;  %v1536_v38 = vpop.f32.mrb[29].mxu0  ;;  %v1577_v15 = vpop.f32.mrb[29].mxu1  ;;  %v1584_v39 = vadd.f32 %v1938_v19, %v1575_v36 }
 0x82a   : > { %v1583_v44 = vadd.f32 %v1937_v34, %v1536_v38  ;;  %v1538_v56 = vpop.f32.mrb[30].mxu0  ;;  %v1579_v57 = vpop.f32.mrb[30].mxu1  ;;  %v1585_v3 = vadd.f32 %v1939_v2, %v1577_v15 }
 0x82b   : > { %v1940_v58 = vmul.f32 -1.442695, %v1582_v37  ;;  %v1539_v60 = vpop.f32.mrb[31].mxu0  ;;  %v1580_v5 = vpop.f32.mrb[31].mxu1 }
 0x82c   : > { %v1941_v61 = vmul.f32 -1.442695, %v1583_v44  ;;  %v1942_v21 = vmul.f32 -1.442695, %v1585_v3 }
 0x82d   : > { %2146 = vpow2.f32 %v1940_v58 }
 0x82e   : > { %2148 = vpow2.f32 %v1941_v61 }
 0x82f   : > { %2150 = vpow2.f32 %v1942_v21 }
 0x830   : > { %2152 = vtanh.f32 %v1584_v39 }
 0x837   : > { %v2147_v22 = vpop.eup %2146 }
 0x838   : > { %v2149_v23 = vpop.eup %2148  ;;  %v1589_v24 = vadd.f32 1.0, %v2147_v22 }
 0x839   : > { %v1595_v1 = vadd.f32 1.0, %v2149_v23  ;;  %v2151_v59 = vpop.eup %2150 }
 0x83a   : > { %2154 = vrcp.f32 %v1589_v24  ;;  %v2153_v62 = vpop.eup %2152  ;;  %v1602_v48 = vadd.f32 1.0, %v2151_v59 }
 0x83b   : > { %2156 = vrcp.f32 %v1595_v1 }
 0x83c   : > { %2158 = vrcp.f32 %v1602_v48 }
 0x844   : > { %v2155_v4 = vpop.eup %2154 }
 0x845   : > { %v2157_v45 = vpop.eup %2156  ;;  %v1606_v43 = vmul.f32 %v2155_v4, %v2153_v62 }
 0x846   : > { %v1605_v7 = vmul.f32 %v2157_v45, %v1481_v28  ;;  %v2159_v0 = vpop.eup %2158 }
 0x848   : > { %v1607_v12 = vadd.f32 %v1606_v43, %v1605_v7 }
 0x84a   : > { %2160 = vtanh.f32 %v1607_v12 }
 0x854   : > { %v2161_v42 = vpop.eup %2160 }
 0x855   : > { %v1609_v46 = vmul.f32 %v2161_v42, %v2159_v0 }
 0x857   : > { %v1617_v47 = vsel %vm1616_vm0, %v1609_v46, %v1479_v8  ;;  %v1621_v63 = vsel %vm1616_vm0, %v1609_v46, 0.0 }
 0x858   : > { %1944 = vst [vmem:[%s1771_s14 + $0x38] sm:$0xff] %v1621_v63  ;;  %1629 = vst [vmem:[%s318_s22] sm:$0xff] %v1617_v47 }
 0x859 PF: > { %s15_s17 = sadd.s32 1, %s2216_s17   ;;  %s2889_s15 = smov %s2212_s16 }
 0x85a   : > { %p12_p5 = scmp.ge.s32.totalorder %s15_s17, 4   ;;  %s2890_s16 = smov %s2892_s18 }
 0x85c   :  { %14 = sbr.rel (!%p12_p5) target bundleno = 2 (0x2), region = 101 }

</bundles_post_ra>
